<compile_context>
chip_gen: v7x
topology: tpu7x:2x2x1
jax: 0.10.0
libtpu: 0.0.40
codegen_flags: <defaults>
</compile_context>

<pallas_src>
import functools

import jax
import jax.numpy as jnp
from jax.experimental import pallas as pl
from jax.experimental.pallas import tpu as pltpu

# Deterministic stand-in for ftrns1_diff (a fixed linear coordinate transform).
_T = jnp.array([[100.0,   5.0, 0.0],
                [ -3.0, 120.0, 0.0],
                [  0.0,   0.0, 1.0]], dtype=jnp.float32)


def ftrns1(x):
    return x @ _T


def _softplus(x):
    # stable softplus, matches torch.nn.Softplus(beta=1)
    return jnp.maximum(x, 0.0) + jnp.log(1.0 + jnp.exp(-jnp.abs(x)))


def _round_up(x, m):
    return ((x + m - 1) // m) * m


def _magnitude_pairs_kernel(kp, w_ref, c_ref, qdat_ref, sdat_ref, out_ref):
    # ---- anisotropic k-NN interpolation of the (already phase-selected) bias ----
    # Fused per-k accumulation: live data is a handful of lane-dense [TQ, TS]
    # slabs (no [TQ, Kp, TS] f32 temporaries, no XLU sublane reduce).
    tq = w_ref.shape[0]
    ts = w_ref.shape[2]
    wsum = jnp.zeros((tq, ts), jnp.float32)
    num = jnp.zeros((tq, ts), jnp.float32)
    for kk in range(kp):                       # kp is a compile-time constant
        w_k = w_ref[:, kk, :]                  # bf16 [TQ, TS]
        c_k = c_ref[:, kk, :]                  # bf16 [TQ, TS]
        wsum = wsum + w_k.astype(jnp.float32)
        num = num + (w_k * c_k).astype(jnp.float32)   # bf16 mult, f32 accumulate

    wsum = jnp.where(wsum == 0.0, 1.0, wsum)
    bias = num * pl.reciprocal(wsum, approx=True)      # [TQ, TS]

    # ---- pairwise log-distance epilogue (fudge = 1.0) ----
    q = qdat_ref[...]      # [TQ, 8] cols: sh0 sh1 sh2 src_z mag . . .
    s = sdat_ref[...]      # [8, TS] rows: th0 th1 th2 sta_z softplus(mc) softplus(ec) dc .
    d0 = q[:, 0:1] - s[0:1, :]
    d1 = q[:, 1:2] - s[1:2, :]
    d2 = q[:, 2:3] - s[2:3, :]
    pw_zero = jnp.log10(jnp.sqrt(d0 * d0 + d1 * d1 + d2 * d2) + 1.0)
    pw_depth = jnp.log10(jnp.abs(q[:, 3:4] - s[3:4, :]) + 1.0)

    out_ref[...] = (q[:, 4:5] * s[4:5, :]
                    - s[5:6, :] * pw_zero
                    + s[6:7, :] * pw_depth
                    + bias)


def magnitude_backup_forward(params, x_grid, locs_ref, sta, src, mag, phase, k=15):
    """Pallas-backed equivalent of MagnitudeBackup.forward(..., method='pairs')."""
    zvec = jnp.array([[1.0, 1.0, 0.0]], dtype=jnp.float32)
    Q, S = src.shape[0], sta.shape[0]

    # --- glue: coordinate transforms, kNN, integer gathers (no clean BlockSpec form) ---
    # TODO(synk): kNN search + the data-dependent row gather stay in plain JAX glue.
    # TODO(synk): when G*S is small enough, a scalar-prefetched-nbr + VMEM-resident
    #   coefficient-table variant would avoid materializing the [Q,K,S] streams at all.
    pos_grid = ftrns1(x_grid) / 1000.0
    pos_src = ftrns1(src) / 1000.0
    locs_ref_cart = ftrns1(locs_ref) / 1000.0
    sta_pos = ftrns1(sta) / 1000.0

    # station -> nearest reference location (k=1)
    d2_ref = jnp.sum((sta_pos[:, None, :] - locs_ref_cart[None, :, :]) ** 2, axis=-1)
    sta_ind = jnp.argmin(d2_ref, axis=1)                             # [S]
    # source query -> k nearest grid points
    d2_grid = jnp.sum((pos_src[:, None, :] - pos_grid[None, :, :]) ** 2, axis=-1)
    _, nbr = jax.lax.top_k(-d2_grid, k)                              # [Q, k]

    # Hoisted transcendentals: softplus + reciprocal on the tiny [G, S, 3] array,
    # and phase-channel selection on [G, S], BEFORE the k-NN gather.
    inv_ker = 1.0 / _softplus(params['coefs_ker'][:, sta_ind, :])    # [G, S, 3]
    coefs_sel = params['coefs'][:, sta_ind, :]                       # [G, S, 2]
    # phase assumed in {0, 1} (P / S), as in the PyTorch module.
    c_sel = jnp.where(phase[None, :] == 0,
                      coefs_sel[..., 0], coefs_sel[..., 1])          # [G, S]

    dpos = pos_grid[nbr] - pos_src[:, None, :]                       # [Q, k, 3]
    r = dpos[:, :, None, :] * inv_ker[nbr]                           # [Q, k, S, 3]
    rsq = jnp.sum(r * r, axis=-1)                                    # [Q, k, S]
    # exp hoisted into the glue (fuses with the gather); w in [0,1] is bf16-safe.
    w = jnp.exp(-0.5 * rsq)                                          # [Q, k, S]
    c_g = c_sel[nbr]                                                 # [Q, k, S]

    # epilogue vectors
    srch = ftrns1(src * zvec)                                        # [Q, 3]
    stah = ftrns1(sta * zvec)                                        # [S, 3]
    mc = _softplus(params['mag_coef'])[phase]                        # [S]
    ec = _softplus(params['epicenter_spatial_coef'])[phase]          # [S]
    dc = params['depth_spatial_coef'][phase]                         # [S]

    # --- padding / tiling ---
    Kp = _round_up(k, 16)                      # bf16 min trailing tile is (16, 128)
    TS = min(_round_up(S, 128), 1024)
    Sp = _round_up(S, TS)                      # pad UP to a TS multiple (keep tiles big)
    TQ = min(_round_up(Q, 8), 256)
    Qp = _round_up(Q, TQ)
    if Qp // TQ == 1 and Sp // TS == 1 and TQ > 8:
        # Single-tile grid: split Q so both TensorCores (v7x megacore) get work.
        TQ = _round_up(pl.cdiv(TQ, 2), 8)
        Qp = _round_up(Q, TQ)

    # Padded neighbors / stations / queries get w = 0 (contribute nothing; padded
    # output rows/cols are sliced off anyway).
    w_p = jnp.pad(w, ((0, Qp - Q), (0, Kp - k), (0, Sp - S))).astype(jnp.bfloat16)
    c_p = jnp.pad(c_g, ((0, Qp - Q), (0, Kp - k), (0, Sp - S))).astype(jnp.bfloat16)

    qdat = jnp.zeros((Qp, 8), jnp.float32)
    qdat = qdat.at[:Q, 0:3].set(srch)
    qdat = qdat.at[:Q, 3].set(src[:, 2])
    qdat = qdat.at[:Q, 4].set(mag.reshape(-1).astype(jnp.float32))

    sdat = jnp.zeros((8, Sp), jnp.float32)
    sdat = sdat.at[0:3, :S].set(stah.T)
    sdat = sdat.at[3, :S].set(sta[:, 2])
    sdat = sdat.at[4, :S].set(mc)
    sdat = sdat.at[5, :S].set(ec)
    sdat = sdat.at[6, :S].set(dc)

    grid = (Qp // TQ, Sp // TS)
    big_spec = lambda: pl.BlockSpec((TQ, Kp, TS), lambda i, j: (i, 0, j))

    cost = pl.CostEstimate(
        flops=int(3 * Qp * Kp * Sp + 20 * Qp * Sp),
        transcendentals=int(4 * Qp * Sp),
        bytes_accessed=int(2 * 2 * Qp * Kp * Sp + 4 * Qp * Sp),
    )

    out = pl.pallas_call(
        functools.partial(_magnitude_pairs_kernel, Kp),
        out_shape=jax.ShapeDtypeStruct((Qp, Sp), jnp.float32),
        grid=grid,
        in_specs=[
            big_spec(),                                      # w    [Qp, Kp, Sp] bf16
            big_spec(),                                      # c    [Qp, Kp, Sp] bf16
            pl.BlockSpec((TQ, 8), lambda i, j: (i, 0)),      # qdat [Qp, 8]
            pl.BlockSpec((8, TS), lambda i, j: (0, j)),      # sdat [8, Sp]
        ],
        out_specs=pl.BlockSpec((TQ, TS), lambda i, j: (i, j)),
        compiler_params=pltpu.CompilerParams(
            dimension_semantics=("parallel", "parallel"),
            vmem_limit_bytes=48 << 20),
        cost_estimate=cost,
    )(w_p, c_p, qdat, sdat)

    return out[:Q, :S]


def reference_forward(params, x_grid, locs_ref, sta, src, mag, phase, k=15):
    """Pure-JAX (f32) mirror of the PyTorch 'pairs' forward, for validation."""
    zvec = jnp.array([[1.0, 1.0, 0.0]], dtype=jnp.float32)
    pos_grid = ftrns1(x_grid) / 1000.0
    pos_src = ftrns1(src) / 1000.0
    locs_ref_cart = ftrns1(locs_ref) / 1000.0
    sta_pos = ftrns1(sta) / 1000.0
    sta_ind = jnp.argmin(
        jnp.sum((sta_pos[:, None, :] - locs_ref_cart[None, :, :]) ** 2, -1), axis=1)
    d2 = jnp.sum((pos_src[:, None, :] - pos_grid[None, :, :]) ** 2, -1)
    _, nbr = jax.lax.top_k(-d2, k)

    coefs_sel = params['coefs'][:, sta_ind, :]
    ker_sel = _softplus(params['coefs_ker'][:, sta_ind, :])
    dpos = pos_grid[nbr] - pos_src[:, None, :]                         # [Q,k,3]
    ratio = dpos[:, :, None, :] / ker_sel[nbr]                         # [Q,k,S,3]
    w = jnp.exp(-0.5 * jnp.sum(ratio ** 2, -1))                        # [Q,k,S]
    wsum = jnp.sum(w, axis=1, keepdims=True)
    wsum = jnp.where(wsum == 0.0, 1.0, wsum)
    wn = w / wsum
    bias_l = jnp.sum(wn[..., None] * coefs_sel[nbr], axis=1)           # [Q,S,2]
    bias = jnp.where(phase[None, :] == 0, bias_l[..., 0], bias_l[..., 1])

    pw0 = jnp.log10(jnp.linalg.norm(
        ftrns1(src * zvec)[:, None, :] - ftrns1(sta * zvec)[None, :, :], axis=2) + 1.0)
    pwd = jnp.log10(jnp.abs(src[:, 2:3] - sta[:, 2][None, :]) + 1.0)

    mcp = _softplus(params['mag_coef'])[phase][None, :]
    ecp = _softplus(params['epicenter_spatial_coef'])[phase][None, :]
    dcp = params['depth_spatial_coef'][phase][None, :]
    return mag.reshape(-1, 1) * mcp - ecp * pw0 + dcp * pwd + bias


def _make_case(seed, G, R, Q, S, sig=10.0):
    key = jax.random.PRNGKey(seed)
    keys = jax.random.split(key, 12)

    def make_points(k1, k2, n):
        xy = jax.random.uniform(k1, (n, 2), minval=-1.0, maxval=1.0)
        z = jax.random.uniform(k2, (n, 1), minval=0.0, maxval=10.0)
        return jnp.concatenate([xy, z], axis=1).astype(jnp.float32)

    x_grid = make_points(keys[0], keys[1], G)
    locs_ref = make_points(keys[2], keys[3], R)
    sta = make_points(keys[4], keys[5], S)
    src = make_points(keys[6], keys[7], Q)
    mag = jax.random.uniform(keys[8], (Q,), minval=1.0, maxval=4.0).astype(jnp.float32)
    phase = (jax.random.bernoulli(keys[9], 0.5, (S,))).astype(jnp.int32)

    params = {
        'mag_coef': jnp.array([1.0, 0.8], dtype=jnp.float32),
        'epicenter_spatial_coef': jnp.array([1.0, 1.2], dtype=jnp.float32),
        'depth_spatial_coef': jnp.array([0.1, -0.05], dtype=jnp.float32),
        'coefs': 0.1 * jax.random.normal(keys[10], (G, R, 2), dtype=jnp.float32),
        'coefs_ker': (sig * jnp.ones((G, R, 3), dtype=jnp.float32)
                      + 0.5 * jax.random.normal(keys[11], (G, R, 3), dtype=jnp.float32)),
    }
    return params, x_grid, locs_ref, sta, src, mag, phase


if __name__ == "__main__":
    K = 15
    # Case 1: small shapes (single tile after padding).
    # Case 2: larger shapes exercising the multi-block Q grid + S/K padding paths.
    cases = [dict(seed=0, G=32, R=12, Q=8, S=8),
             dict(seed=1, G=64, R=20, Q=200, S=300)]

    for cfg in cases:
        params, x_grid, locs_ref, sta, src, mag, phase = _make_case(**cfg)
        log_amp = magnitude_backup_forward(params, x_grid, locs_ref, sta, src,
                                           mag, phase, k=K)
        log_amp = jax.block_until_ready(log_amp)
        ref = reference_forward(params, x_grid, locs_ref, sta, src, mag, phase, k=K)
        assert log_amp.shape == (cfg['Q'], cfg['S'])
        # bf16 storage of the gathered interpolation tensors -> relaxed tolerance.
        assert jnp.allclose(log_amp, ref, rtol=1e-2, atol=1e-2), (
            f"case {cfg}: max abs err {jnp.max(jnp.abs(log_amp - ref))}")

    print("KERNEL_OK")
</pallas_src>

<mosaic_0001>
module attributes {stable_mosaic.version = 11 : i64} {
  func.func @_magnitude_pairs_kernel(%arg0: i32, %arg1: i32, %arg2: memref<8x16x128xbf16, #tpu.memory_space<vmem>>, %arg3: memref<8x16x128xbf16, #tpu.memory_space<vmem>>, %arg4: memref<8x8xf32, #tpu.memory_space<vmem>>, %arg5: memref<8x128xf32, #tpu.memory_space<vmem>>, %arg6: memref<8x128xf32, #tpu.memory_space<vmem>>) attributes {dimension_semantics = [#tpu.dimension_semantics<parallel>, #tpu.dimension_semantics<parallel>], iteration_bounds = array<i64: 1, 1>, scalar_prefetch = 0 : i64, scratch_operands = 0 : i64, tpu.core_type = #tpu.core_type<tc>, window_params = [{transform_indices = @transform_0, window_bounds = array<i64: 8, 16, 128>}, {transform_indices = @transform_1, window_bounds = array<i64: 8, 16, 128>}, {transform_indices = @transform_2, window_bounds = array<i64: 8, 8>}, {transform_indices = @transform_3, window_bounds = array<i64: 8, 128>}, {transform_indices = @transform_4, window_bounds = array<i64: 8, 128>}]} {
    %cst = arith.constant 0.000000e+00 : f32
    %0 = vector.broadcast %cst : f32 to vector<8x128xf32>
    %cst_0 = arith.constant 0.000000e+00 : f32
    %1 = vector.broadcast %cst_0 : f32 to vector<8x128xf32>
    %c0 = arith.constant 0 : index
    %c0_1 = arith.constant 0 : index
    %c0_2 = arith.constant 0 : index
    %2 = vector.load %arg2[%c0, %c0_1, %c0_2] : memref<8x16x128xbf16, #tpu.memory_space<vmem>>, vector<8x1x128xbf16>
    %3 = vector.shape_cast %2 : vector<8x1x128xbf16> to vector<8x128xbf16>
    %c0_3 = arith.constant 0 : index
    %c0_4 = arith.constant 0 : index
    %c0_5 = arith.constant 0 : index
    %4 = vector.load %arg3[%c0_3, %c0_4, %c0_5] : memref<8x16x128xbf16, #tpu.memory_space<vmem>>, vector<8x1x128xbf16>
    %5 = vector.shape_cast %4 : vector<8x1x128xbf16> to vector<8x128xbf16>
    %6 = arith.extf %3 : vector<8x128xbf16> to vector<8x128xf32>
    %7 = arith.addf %0, %6 : vector<8x128xf32>
    %8 = arith.mulf %3, %5 : vector<8x128xbf16>
    %9 = arith.extf %8 : vector<8x128xbf16> to vector<8x128xf32>
    %10 = arith.addf %1, %9 : vector<8x128xf32>
    %c0_6 = arith.constant 0 : index
    %c1 = arith.constant 1 : index
    %c0_7 = arith.constant 0 : index
    %11 = vector.load %arg2[%c0_6, %c1, %c0_7] : memref<8x16x128xbf16, #tpu.memory_space<vmem>>, vector<8x1x128xbf16>
    %12 = vector.shape_cast %11 : vector<8x1x128xbf16> to vector<8x128xbf16>
    %c0_8 = arith.constant 0 : index
    %c1_9 = arith.constant 1 : index
    %c0_10 = arith.constant 0 : index
    %13 = vector.load %arg3[%c0_8, %c1_9, %c0_10] : memref<8x16x128xbf16, #tpu.memory_space<vmem>>, vector<8x1x128xbf16>
    %14 = vector.shape_cast %13 : vector<8x1x128xbf16> to vector<8x128xbf16>
    %15 = arith.extf %12 : vector<8x128xbf16> to vector<8x128xf32>
    %16 = arith.addf %7, %15 : vector<8x128xf32>
    %17 = arith.mulf %12, %14 : vector<8x128xbf16>
    %18 = arith.extf %17 : vector<8x128xbf16> to vector<8x128xf32>
    %19 = arith.addf %10, %18 : vector<8x128xf32>
    %c0_11 = arith.constant 0 : index
    %c2 = arith.constant 2 : index
    %c0_12 = arith.constant 0 : index
    %20 = vector.load %arg2[%c0_11, %c2, %c0_12] : memref<8x16x128xbf16, #tpu.memory_space<vmem>>, vector<8x1x128xbf16>
    %21 = vector.shape_cast %20 : vector<8x1x128xbf16> to vector<8x128xbf16>
    %c0_13 = arith.constant 0 : index
    %c2_14 = arith.constant 2 : index
    %c0_15 = arith.constant 0 : index
    %22 = vector.load %arg3[%c0_13, %c2_14, %c0_15] : memref<8x16x128xbf16, #tpu.memory_space<vmem>>, vector<8x1x128xbf16>
    %23 = vector.shape_cast %22 : vector<8x1x128xbf16> to vector<8x128xbf16>
    %24 = arith.extf %21 : vector<8x128xbf16> to vector<8x128xf32>
    %25 = arith.addf %16, %24 : vector<8x128xf32>
    %26 = arith.mulf %21, %23 : vector<8x128xbf16>
    %27 = arith.extf %26 : vector<8x128xbf16> to vector<8x128xf32>
    %28 = arith.addf %19, %27 : vector<8x128xf32>
    %c0_16 = arith.constant 0 : index
    %c3 = arith.constant 3 : index
    %c0_17 = arith.constant 0 : index
    %29 = vector.load %arg2[%c0_16, %c3, %c0_17] : memref<8x16x128xbf16, #tpu.memory_space<vmem>>, vector<8x1x128xbf16>
    %30 = vector.shape_cast %29 : vector<8x1x128xbf16> to vector<8x128xbf16>
    %c0_18 = arith.constant 0 : index
    %c3_19 = arith.constant 3 : index
    %c0_20 = arith.constant 0 : index
    %31 = vector.load %arg3[%c0_18, %c3_19, %c0_20] : memref<8x16x128xbf16, #tpu.memory_space<vmem>>, vector<8x1x128xbf16>
    %32 = vector.shape_cast %31 : vector<8x1x128xbf16> to vector<8x128xbf16>
    %33 = arith.extf %30 : vector<8x128xbf16> to vector<8x128xf32>
    %34 = arith.addf %25, %33 : vector<8x128xf32>
    %35 = arith.mulf %30, %32 : vector<8x128xbf16>
    %36 = arith.extf %35 : vector<8x128xbf16> to vector<8x128xf32>
    %37 = arith.addf %28, %36 : vector<8x128xf32>
    %c0_21 = arith.constant 0 : index
    %c4 = arith.constant 4 : index
    %c0_22 = arith.constant 0 : index
    %38 = vector.load %arg2[%c0_21, %c4, %c0_22] : memref<8x16x128xbf16, #tpu.memory_space<vmem>>, vector<8x1x128xbf16>
    %39 = vector.shape_cast %38 : vector<8x1x128xbf16> to vector<8x128xbf16>
    %c0_23 = arith.constant 0 : index
    %c4_24 = arith.constant 4 : index
    %c0_25 = arith.constant 0 : index
    %40 = vector.load %arg3[%c0_23, %c4_24, %c0_25] : memref<8x16x128xbf16, #tpu.memory_space<vmem>>, vector<8x1x128xbf16>
    %41 = vector.shape_cast %40 : vector<8x1x128xbf16> to vector<8x128xbf16>
    %42 = arith.extf %39 : vector<8x128xbf16> to vector<8x128xf32>
    %43 = arith.addf %34, %42 : vector<8x128xf32>
    %44 = arith.mulf %39, %41 : vector<8x128xbf16>
    %45 = arith.extf %44 : vector<8x128xbf16> to vector<8x128xf32>
    %46 = arith.addf %37, %45 : vector<8x128xf32>
    %c0_26 = arith.constant 0 : index
    %c5 = arith.constant 5 : index
    %c0_27 = arith.constant 0 : index
    %47 = vector.load %arg2[%c0_26, %c5, %c0_27] : memref<8x16x128xbf16, #tpu.memory_space<vmem>>, vector<8x1x128xbf16>
    %48 = vector.shape_cast %47 : vector<8x1x128xbf16> to vector<8x128xbf16>
    %c0_28 = arith.constant 0 : index
    %c5_29 = arith.constant 5 : index
    %c0_30 = arith.constant 0 : index
    %49 = vector.load %arg3[%c0_28, %c5_29, %c0_30] : memref<8x16x128xbf16, #tpu.memory_space<vmem>>, vector<8x1x128xbf16>
    %50 = vector.shape_cast %49 : vector<8x1x128xbf16> to vector<8x128xbf16>
    %51 = arith.extf %48 : vector<8x128xbf16> to vector<8x128xf32>
    %52 = arith.addf %43, %51 : vector<8x128xf32>
    %53 = arith.mulf %48, %50 : vector<8x128xbf16>
    %54 = arith.extf %53 : vector<8x128xbf16> to vector<8x128xf32>
    %55 = arith.addf %46, %54 : vector<8x128xf32>
    %c0_31 = arith.constant 0 : index
    %c6 = arith.constant 6 : index
    %c0_32 = arith.constant 0 : index
    %56 = vector.load %arg2[%c0_31, %c6, %c0_32] : memref<8x16x128xbf16, #tpu.memory_space<vmem>>, vector<8x1x128xbf16>
    %57 = vector.shape_cast %56 : vector<8x1x128xbf16> to vector<8x128xbf16>
    %c0_33 = arith.constant 0 : index
    %c6_34 = arith.constant 6 : index
    %c0_35 = arith.constant 0 : index
    %58 = vector.load %arg3[%c0_33, %c6_34, %c0_35] : memref<8x16x128xbf16, #tpu.memory_space<vmem>>, vector<8x1x128xbf16>
    %59 = vector.shape_cast %58 : vector<8x1x128xbf16> to vector<8x128xbf16>
    %60 = arith.extf %57 : vector<8x128xbf16> to vector<8x128xf32>
    %61 = arith.addf %52, %60 : vector<8x128xf32>
    %62 = arith.mulf %57, %59 : vector<8x128xbf16>
    %63 = arith.extf %62 : vector<8x128xbf16> to vector<8x128xf32>
    %64 = arith.addf %55, %63 : vector<8x128xf32>
    %c0_36 = arith.constant 0 : index
    %c7 = arith.constant 7 : index
    %c0_37 = arith.constant 0 : index
    %65 = vector.load %arg2[%c0_36, %c7, %c0_37] : memref<8x16x128xbf16, #tpu.memory_space<vmem>>, vector<8x1x128xbf16>
    %66 = vector.shape_cast %65 : vector<8x1x128xbf16> to vector<8x128xbf16>
    %c0_38 = arith.constant 0 : index
    %c7_39 = arith.constant 7 : index
    %c0_40 = arith.constant 0 : index
    %67 = vector.load %arg3[%c0_38, %c7_39, %c0_40] : memref<8x16x128xbf16, #tpu.memory_space<vmem>>, vector<8x1x128xbf16>
    %68 = vector.shape_cast %67 : vector<8x1x128xbf16> to vector<8x128xbf16>
    %69 = arith.extf %66 : vector<8x128xbf16> to vector<8x128xf32>
    %70 = arith.addf %61, %69 : vector<8x128xf32>
    %71 = arith.mulf %66, %68 : vector<8x128xbf16>
    %72 = arith.extf %71 : vector<8x128xbf16> to vector<8x128xf32>
    %73 = arith.addf %64, %72 : vector<8x128xf32>
    %c0_41 = arith.constant 0 : index
    %c8 = arith.constant 8 : index
    %c0_42 = arith.constant 0 : index
    %74 = vector.load %arg2[%c0_41, %c8, %c0_42] : memref<8x16x128xbf16, #tpu.memory_space<vmem>>, vector<8x1x128xbf16>
    %75 = vector.shape_cast %74 : vector<8x1x128xbf16> to vector<8x128xbf16>
    %c0_43 = arith.constant 0 : index
    %c8_44 = arith.constant 8 : index
    %c0_45 = arith.constant 0 : index
    %76 = vector.load %arg3[%c0_43, %c8_44, %c0_45] : memref<8x16x128xbf16, #tpu.memory_space<vmem>>, vector<8x1x128xbf16>
    %77 = vector.shape_cast %76 : vector<8x1x128xbf16> to vector<8x128xbf16>
    %78 = arith.extf %75 : vector<8x128xbf16> to vector<8x128xf32>
    %79 = arith.addf %70, %78 : vector<8x128xf32>
    %80 = arith.mulf %75, %77 : vector<8x128xbf16>
    %81 = arith.extf %80 : vector<8x128xbf16> to vector<8x128xf32>
    %82 = arith.addf %73, %81 : vector<8x128xf32>
    %c0_46 = arith.constant 0 : index
    %c9 = arith.constant 9 : index
    %c0_47 = arith.constant 0 : index
    %83 = vector.load %arg2[%c0_46, %c9, %c0_47] : memref<8x16x128xbf16, #tpu.memory_space<vmem>>, vector<8x1x128xbf16>
    %84 = vector.shape_cast %83 : vector<8x1x128xbf16> to vector<8x128xbf16>
    %c0_48 = arith.constant 0 : index
    %c9_49 = arith.constant 9 : index
    %c0_50 = arith.constant 0 : index
    %85 = vector.load %arg3[%c0_48, %c9_49, %c0_50] : memref<8x16x128xbf16, #tpu.memory_space<vmem>>, vector<8x1x128xbf16>
    %86 = vector.shape_cast %85 : vector<8x1x128xbf16> to vector<8x128xbf16>
    %87 = arith.extf %84 : vector<8x128xbf16> to vector<8x128xf32>
    %88 = arith.addf %79, %87 : vector<8x128xf32>
    %89 = arith.mulf %84, %86 : vector<8x128xbf16>
    %90 = arith.extf %89 : vector<8x128xbf16> to vector<8x128xf32>
    %91 = arith.addf %82, %90 : vector<8x128xf32>
    %c0_51 = arith.constant 0 : index
    %c10 = arith.constant 10 : index
    %c0_52 = arith.constant 0 : index
    %92 = vector.load %arg2[%c0_51, %c10, %c0_52] : memref<8x16x128xbf16, #tpu.memory_space<vmem>>, vector<8x1x128xbf16>
    %93 = vector.shape_cast %92 : vector<8x1x128xbf16> to vector<8x128xbf16>
    %c0_53 = arith.constant 0 : index
    %c10_54 = arith.constant 10 : index
    %c0_55 = arith.constant 0 : index
    %94 = vector.load %arg3[%c0_53, %c10_54, %c0_55] : memref<8x16x128xbf16, #tpu.memory_space<vmem>>, vector<8x1x128xbf16>
    %95 = vector.shape_cast %94 : vector<8x1x128xbf16> to vector<8x128xbf16>
    %96 = arith.extf %93 : vector<8x128xbf16> to vector<8x128xf32>
    %97 = arith.addf %88, %96 : vector<8x128xf32>
    %98 = arith.mulf %93, %95 : vector<8x128xbf16>
    %99 = arith.extf %98 : vector<8x128xbf16> to vector<8x128xf32>
    %100 = arith.addf %91, %99 : vector<8x128xf32>
    %c0_56 = arith.constant 0 : index
    %c11 = arith.constant 11 : index
    %c0_57 = arith.constant 0 : index
    %101 = vector.load %arg2[%c0_56, %c11, %c0_57] : memref<8x16x128xbf16, #tpu.memory_space<vmem>>, vector<8x1x128xbf16>
    %102 = vector.shape_cast %101 : vector<8x1x128xbf16> to vector<8x128xbf16>
    %c0_58 = arith.constant 0 : index
    %c11_59 = arith.constant 11 : index
    %c0_60 = arith.constant 0 : index
    %103 = vector.load %arg3[%c0_58, %c11_59, %c0_60] : memref<8x16x128xbf16, #tpu.memory_space<vmem>>, vector<8x1x128xbf16>
    %104 = vector.shape_cast %103 : vector<8x1x128xbf16> to vector<8x128xbf16>
    %105 = arith.extf %102 : vector<8x128xbf16> to vector<8x128xf32>
    %106 = arith.addf %97, %105 : vector<8x128xf32>
    %107 = arith.mulf %102, %104 : vector<8x128xbf16>
    %108 = arith.extf %107 : vector<8x128xbf16> to vector<8x128xf32>
    %109 = arith.addf %100, %108 : vector<8x128xf32>
    %c0_61 = arith.constant 0 : index
    %c12 = arith.constant 12 : index
    %c0_62 = arith.constant 0 : index
    %110 = vector.load %arg2[%c0_61, %c12, %c0_62] : memref<8x16x128xbf16, #tpu.memory_space<vmem>>, vector<8x1x128xbf16>
    %111 = vector.shape_cast %110 : vector<8x1x128xbf16> to vector<8x128xbf16>
    %c0_63 = arith.constant 0 : index
    %c12_64 = arith.constant 12 : index
    %c0_65 = arith.constant 0 : index
    %112 = vector.load %arg3[%c0_63, %c12_64, %c0_65] : memref<8x16x128xbf16, #tpu.memory_space<vmem>>, vector<8x1x128xbf16>
    %113 = vector.shape_cast %112 : vector<8x1x128xbf16> to vector<8x128xbf16>
    %114 = arith.extf %111 : vector<8x128xbf16> to vector<8x128xf32>
    %115 = arith.addf %106, %114 : vector<8x128xf32>
    %116 = arith.mulf %111, %113 : vector<8x128xbf16>
    %117 = arith.extf %116 : vector<8x128xbf16> to vector<8x128xf32>
    %118 = arith.addf %109, %117 : vector<8x128xf32>
    %c0_66 = arith.constant 0 : index
    %c13 = arith.constant 13 : index
    %c0_67 = arith.constant 0 : index
    %119 = vector.load %arg2[%c0_66, %c13, %c0_67] : memref<8x16x128xbf16, #tpu.memory_space<vmem>>, vector<8x1x128xbf16>
    %120 = vector.shape_cast %119 : vector<8x1x128xbf16> to vector<8x128xbf16>
    %c0_68 = arith.constant 0 : index
    %c13_69 = arith.constant 13 : index
    %c0_70 = arith.constant 0 : index
    %121 = vector.load %arg3[%c0_68, %c13_69, %c0_70] : memref<8x16x128xbf16, #tpu.memory_space<vmem>>, vector<8x1x128xbf16>
    %122 = vector.shape_cast %121 : vector<8x1x128xbf16> to vector<8x128xbf16>
    %123 = arith.extf %120 : vector<8x128xbf16> to vector<8x128xf32>
    %124 = arith.addf %115, %123 : vector<8x128xf32>
    %125 = arith.mulf %120, %122 : vector<8x128xbf16>
    %126 = arith.extf %125 : vector<8x128xbf16> to vector<8x128xf32>
    %127 = arith.addf %118, %126 : vector<8x128xf32>
    %c0_71 = arith.constant 0 : index
    %c14 = arith.constant 14 : index
    %c0_72 = arith.constant 0 : index
    %128 = vector.load %arg2[%c0_71, %c14, %c0_72] : memref<8x16x128xbf16, #tpu.memory_space<vmem>>, vector<8x1x128xbf16>
    %129 = vector.shape_cast %128 : vector<8x1x128xbf16> to vector<8x128xbf16>
    %c0_73 = arith.constant 0 : index
    %c14_74 = arith.constant 14 : index
    %c0_75 = arith.constant 0 : index
    %130 = vector.load %arg3[%c0_73, %c14_74, %c0_75] : memref<8x16x128xbf16, #tpu.memory_space<vmem>>, vector<8x1x128xbf16>
    %131 = vector.shape_cast %130 : vector<8x1x128xbf16> to vector<8x128xbf16>
    %132 = arith.extf %129 : vector<8x128xbf16> to vector<8x128xf32>
    %133 = arith.addf %124, %132 : vector<8x128xf32>
    %134 = arith.mulf %129, %131 : vector<8x128xbf16>
    %135 = arith.extf %134 : vector<8x128xbf16> to vector<8x128xf32>
    %136 = arith.addf %127, %135 : vector<8x128xf32>
    %c0_76 = arith.constant 0 : index
    %c15 = arith.constant 15 : index
    %c0_77 = arith.constant 0 : index
    %137 = vector.load %arg2[%c0_76, %c15, %c0_77] : memref<8x16x128xbf16, #tpu.memory_space<vmem>>, vector<8x1x128xbf16>
    %138 = vector.shape_cast %137 : vector<8x1x128xbf16> to vector<8x128xbf16>
    %c0_78 = arith.constant 0 : index
    %c15_79 = arith.constant 15 : index
    %c0_80 = arith.constant 0 : index
    %139 = vector.load %arg3[%c0_78, %c15_79, %c0_80] : memref<8x16x128xbf16, #tpu.memory_space<vmem>>, vector<8x1x128xbf16>
    %140 = vector.shape_cast %139 : vector<8x1x128xbf16> to vector<8x128xbf16>
    %141 = arith.extf %138 : vector<8x128xbf16> to vector<8x128xf32>
    %142 = arith.addf %133, %141 : vector<8x128xf32>
    %143 = arith.mulf %138, %140 : vector<8x128xbf16>
    %144 = arith.extf %143 : vector<8x128xbf16> to vector<8x128xf32>
    %145 = arith.addf %136, %144 : vector<8x128xf32>
    %cst_81 = arith.constant 0.000000e+00 : f32
    %146 = vector.broadcast %cst_81 : f32 to vector<8x128xf32>
    %147 = arith.cmpf oeq, %142, %146 : vector<8x128xf32>
    %cst_82 = arith.constant 1.000000e+00 : f32
    %148 = vector.broadcast %cst_82 : f32 to vector<8x128xf32>
    %149 = arith.select %147, %148, %142 : vector<8x128xi1>, vector<8x128xf32>
    %150 = tpu.reciprocal %149 {approx = true} : vector<8x128xf32> -> vector<8x128xf32>
    %151 = arith.mulf %145, %150 : vector<8x128xf32>
    %c0_83 = arith.constant 0 : index
    %c0_84 = arith.constant 0 : index
    %152 = vector.load %arg4[%c0_83, %c0_84] : memref<8x8xf32, #tpu.memory_space<vmem>>, vector<8x8xf32>
    %c0_85 = arith.constant 0 : index
    %c0_86 = arith.constant 0 : index
    %153 = vector.load %arg5[%c0_85, %c0_86] : memref<8x128xf32, #tpu.memory_space<vmem>>, vector<8x128xf32>
    %154 = vector.extract_strided_slice %152 {offsets = [0, 0], sizes = [8, 1], strides = [1, 1]} : vector<8x8xf32> to vector<8x1xf32>
    %155 = vector.extract_strided_slice %153 {offsets = [0, 0], sizes = [1, 128], strides = [1, 1]} : vector<8x128xf32> to vector<1x128xf32>
    %156 = vector.broadcast %154 : vector<8x1xf32> to vector<8x128xf32>
    %157 = vector.broadcast %155 : vector<1x128xf32> to vector<8x128xf32>
    %158 = arith.subf %156, %157 : vector<8x128xf32>
    %159 = vector.extract_strided_slice %152 {offsets = [0, 1], sizes = [8, 1], strides = [1, 1]} : vector<8x8xf32> to vector<8x1xf32>
    %160 = vector.extract_strided_slice %153 {offsets = [1, 0], sizes = [1, 128], strides = [1, 1]} : vector<8x128xf32> to vector<1x128xf32>
    %161 = vector.broadcast %159 : vector<8x1xf32> to vector<8x128xf32>
    %162 = vector.broadcast %160 : vector<1x128xf32> to vector<8x128xf32>
    %163 = arith.subf %161, %162 : vector<8x128xf32>
    %164 = vector.extract_strided_slice %152 {offsets = [0, 2], sizes = [8, 1], strides = [1, 1]} : vector<8x8xf32> to vector<8x1xf32>
    %165 = vector.extract_strided_slice %153 {offsets = [2, 0], sizes = [1, 128], strides = [1, 1]} : vector<8x128xf32> to vector<1x128xf32>
    %166 = vector.broadcast %164 : vector<8x1xf32> to vector<8x128xf32>
    %167 = vector.broadcast %165 : vector<1x128xf32> to vector<8x128xf32>
    %168 = arith.subf %166, %167 : vector<8x128xf32>
    %169 = arith.mulf %158, %158 : vector<8x128xf32>
    %170 = arith.mulf %163, %163 : vector<8x128xf32>
    %171 = arith.addf %169, %170 : vector<8x128xf32>
    %172 = arith.mulf %168, %168 : vector<8x128xf32>
    %173 = arith.addf %171, %172 : vector<8x128xf32>
    %174 = math.sqrt %173 : vector<8x128xf32>
    %cst_87 = arith.constant 1.000000e+00 : f32
    %175 = vector.broadcast %cst_87 : f32 to vector<8x128xf32>
    %176 = arith.addf %174, %175 : vector<8x128xf32>
    %177 = math.log %176 : vector<8x128xf32>
    %cst_88 = arith.constant 0.434294492 : f32
    %178 = vector.broadcast %cst_88 : f32 to vector<8x128xf32>
    %179 = arith.mulf %177, %178 : vector<8x128xf32>
    %180 = vector.extract_strided_slice %152 {offsets = [0, 3], sizes = [8, 1], strides = [1, 1]} : vector<8x8xf32> to vector<8x1xf32>
    %181 = vector.extract_strided_slice %153 {offsets = [3, 0], sizes = [1, 128], strides = [1, 1]} : vector<8x128xf32> to vector<1x128xf32>
    %182 = vector.broadcast %180 : vector<8x1xf32> to vector<8x128xf32>
    %183 = vector.broadcast %181 : vector<1x128xf32> to vector<8x128xf32>
    %184 = arith.subf %182, %183 : vector<8x128xf32>
    %185 = math.absf %184 : vector<8x128xf32>
    %cst_89 = arith.constant 1.000000e+00 : f32
    %186 = vector.broadcast %cst_89 : f32 to vector<8x128xf32>
    %187 = arith.addf %185, %186 : vector<8x128xf32>
    %188 = math.log %187 : vector<8x128xf32>
    %cst_90 = arith.constant 0.434294492 : f32
    %189 = vector.broadcast %cst_90 : f32 to vector<8x128xf32>
    %190 = arith.mulf %188, %189 : vector<8x128xf32>
    %191 = vector.extract_strided_slice %152 {offsets = [0, 4], sizes = [8, 1], strides = [1, 1]} : vector<8x8xf32> to vector<8x1xf32>
    %192 = vector.extract_strided_slice %153 {offsets = [4, 0], sizes = [1, 128], strides = [1, 1]} : vector<8x128xf32> to vector<1x128xf32>
    %193 = vector.broadcast %191 : vector<8x1xf32> to vector<8x128xf32>
    %194 = vector.broadcast %192 : vector<1x128xf32> to vector<8x128xf32>
    %195 = arith.mulf %193, %194 : vector<8x128xf32>
    %196 = vector.extract_strided_slice %153 {offsets = [5, 0], sizes = [1, 128], strides = [1, 1]} : vector<8x128xf32> to vector<1x128xf32>
    %197 = vector.broadcast %196 : vector<1x128xf32> to vector<8x128xf32>
    %198 = arith.mulf %197, %179 : vector<8x128xf32>
    %199 = arith.subf %195, %198 : vector<8x128xf32>
    %200 = vector.extract_strided_slice %153 {offsets = [6, 0], sizes = [1, 128], strides = [1, 1]} : vector<8x128xf32> to vector<1x128xf32>
    %201 = vector.broadcast %200 : vector<1x128xf32> to vector<8x128xf32>
    %202 = arith.mulf %201, %190 : vector<8x128xf32>
    %203 = arith.addf %199, %202 : vector<8x128xf32>
    %204 = arith.addf %203, %151 : vector<8x128xf32>
    %c0_91 = arith.constant 0 : index
    %c0_92 = arith.constant 0 : index
    %205 = vector.load %arg6[%c0_91, %c0_92] : memref<8x128xf32, #tpu.memory_space<vmem>>, vector<8x128xf32>
    tpu.vector_store %arg6[%c0_91, %c0_92], %204 {strides = array<i32>} : memref<8x128xf32, #tpu.memory_space<vmem>>, vector<8x128xf32>,
    return
  }
  func.func @transform_0(%arg0: i32, %arg1: i32) -> (i32, i32, i32) {
    %c0_i32 = arith.constant 0 : i32
    %c0_i32_0 = arith.constant 0 : i32
    return %arg0, %c0_i32, %arg1 : i32, i32, i32
  }
  func.func @transform_1(%arg0: i32, %arg1: i32) -> (i32, i32, i32) {
    %c0_i32 = arith.constant 0 : i32
    %c0_i32_0 = arith.constant 0 : i32
    return %arg0, %c0_i32, %arg1 : i32, i32, i32
  }
  func.func @transform_2(%arg0: i32, %arg1: i32) -> (i32, i32) {
    %c0_i32 = arith.constant 0 : i32
    %c0_i32_0 = arith.constant 0 : i32
    return %arg0, %c0_i32 : i32, i32
  }
  func.func @transform_3(%arg0: i32, %arg1: i32) -> (i32, i32) {
    %c0_i32 = arith.constant 0 : i32
    %c0_i32_0 = arith.constant 0 : i32
    return %c0_i32, %arg1 : i32, i32
  }
  func.func @transform_4(%arg0: i32, %arg1: i32) -> (i32, i32) {
    %c0_i32 = arith.constant 0 : i32
    return %arg0, %arg1 : i32, i32
  }
}

</mosaic_0001>

<bundles_post_ra>
// kernel: tpu_custom_call.1
= control target key start
LH: loop header
LB: loop body
LE: loop exit
PB: predicated region body
PF: predicated region fallthrough
CT: control target
= control target key end

     0   :  { %9 = vsyncpa [#allocation3], 0  ;;  %s2303_s0 = inlined_call_operand.hbm [shape: bf16[8,16,128], index: 0, kind: input, shape index: {}]   ;;  %s2304_s1 = inlined_call_operand.hbm [shape: bf16[8,16,128], index: 1, kind: input, shape index: {}]   ;;  %s2305_s2 = inlined_call_operand.hbm [shape: f32[8,8], index: 2, kind: input, shape index: {}]   ;;  %s2306_s3 = inlined_call_operand.vmem [shape: f32[8,128], index: 3, kind: input, shape index: {}]   ;;  %s2307_s4 = inlined_call_operand.hbm [shape: f32[8,128], index: 4, kind: output, shape index: {}]  }
   0x1   :  { %10 = vsyncpa [#allocation6], 0 }
   0x2   :  { %11 = vsyncpa [#allocation4], 0  ;;  %s1503_s15 = smov [#allocation5]   ;;  %s1504_s17 = smov [#allocation2]  }
   0x3   :  { %s29_s16 = sshll.u32 %s1503_s15, 4  ;;  %s17_s18 = sshll.u32 %s1504_s17, 4  ;;  %s30_s16 = int_to_ptr.vmem [resolvable:$true] %s29_s16  ;;  %s1539_s18 = int_to_ptr.vmem [resolvable:$true] %s17_s18 }
   0x4   :  { %s1409_s21 = scalar_lea.hbm %s2304_s1, 1024 }
   0x5   :  { %p1410_p0 = scmp.ne.s32.totalorder %s2304_s1, %s1409_s21  ;;  %p1413_p1 = scmp.lt.u32.totalorder %s1409_s21, %s2304_s1 }
   0x7   :  { %p1415_p2 = pnand %p1413_p1, %p1410_p0 }
   0x9   :  { %1418 = shalt.err (!%p1415_p2)
}
   0xa   :  { %s1419_s26 = scalar_lea.vmem %s30_s16, 1024  ;;  %p1424_p4 = scmp.lt.s32.totalorder %s30_s16, %s30_s16 }
   0xb   :  { %p1420_p3 = scmp.ne.s32.totalorder %s30_s16, %s1419_s26  ;;  %p1425_p5 = scmp.lt.s32.totalorder %s1419_s26, %s1419_s26 }
   0xd   :  { %p1426_p6 = por %p1425_p5, %p1424_p4 }
   0xf   :  { %p1427_p7 = pnand %p1426_p6, %p1420_p3 }
  0x11   :  { %1430 = shalt.err (!%p1427_p7)
}
  0x12   :  { %s1505_s27 = smov 64   ;;  %s1506_s28 = smov 4  }
  0x13   :  { %35 = dma.hbm_to_vmem [thread:$0]  %s2304_s1, 1024, %s30_s16, [#allocation6], %s1505_s27, %s1505_s27, %s1506_s28  }
  0x14   :  { %s1431_s7 = scalar_lea.hbm %s2303_s0, 1024 }
  0x15   :  { %p1432_p8 = scmp.ne.s32.totalorder %s2303_s0, %s1431_s7  ;;  %p1435_p9 = scmp.lt.u32.totalorder %s1431_s7, %s2303_s0 }
  0x17   :  { %p1437_p10 = pnand %p1435_p9, %p1432_p8 }
  0x19   :  { %1440 = shalt.err (!%p1437_p10)
}
  0x1a   :  { %s1441_s12 = scalar_lea.vmem %s1539_s18, 1024  ;;  %p1446_p12 = scmp.lt.s32.totalorder %s1539_s18, %s1539_s18 }
  0x1b   :  { %p1442_p11 = scmp.ne.s32.totalorder %s1539_s18, %s1441_s12  ;;  %p1447_p13 = scmp.lt.s32.totalorder %s1441_s12, %s1441_s12 }
  0x1d   :  { %p1448_p0 = por %p1447_p13, %p1446_p12 }
  0x1f   :  { %p1449_p1 = pnand %p1448_p0, %p1442_p11 }
  0x21   :  { %1452 = shalt.err (!%p1449_p1)
}
  0x22   :  { %23 = dma.hbm_to_vmem [thread:$0]  %s2303_s0, 1024, %s1539_s18, [#allocation3], %s1505_s27, %s1505_s27, %s1506_s28  }
  0x23   :  { %s1507_s14 = smov [#allocation7]   ;;  %s1453_s19 = scalar_lea.hbm %s2305_s2, 128 }
  0x24   :  { %s42_s15 = sshll.u32 %s1507_s14, 4  ;;  %p1454_p2 = scmp.ne.s32.totalorder %s2305_s2, %s1453_s19  ;;  %s43_s15 = int_to_ptr.vmem [resolvable:$true] %s42_s15 }
  0x25   :  { %p1457_p3 = scmp.lt.u32.totalorder %s1453_s19, %s2305_s2 }
  0x27   :  { %p1459_p4 = pnand %p1457_p3, %p1454_p2 }
  0x29   :  { %1462 = shalt.err (!%p1459_p4)
}
  0x2a   :  { %s1463_s24 = scalar_lea.vmem %s43_s15, 128  ;;  %p1468_p6 = scmp.lt.s32.totalorder %s43_s15, %s43_s15 }
  0x2b   :  { %p1464_p5 = scmp.ne.s32.totalorder %s43_s15, %s1463_s24  ;;  %p1469_p7 = scmp.lt.s32.totalorder %s1463_s24, %s1463_s24 }
  0x2d   :  { %p1470_p8 = por %p1469_p7, %p1468_p6 }
  0x2f   :  { %p1471_p9 = pnand %p1470_p8, %p1464_p5 }
  0x31   :  { %1474 = shalt.err (!%p1471_p9)
}
  0x32   :  { %45 = dma.hbm_to_vmem [thread:$0]  %s2305_s2, 128, %s43_s15, [#allocation6]  }
  0x33   :  { %1497 = dma.done.wait [#allocation3], 1024  }
  0x34   :  { %1498 = vsyncadd [#allocation3], 4294966272 }
  0x35   :  { %1499 = dma.done.wait [#allocation6], 1152  }
  0x36   :  { %1500 = vsyncadd [#allocation6], 4294966144  ;;  %v1508_v0 = vmov 0   ;;  %v1509_v1 = vmov 2   ;;  %v1241_v2 = vld [vmem:[#allocation7] sm:$0xff]  ;;  %v1248_v3 = vlaneseq  ;;  %v1510_v5 = vmov 1  }
  0x37   :  { %1381 = vset.pattern.permute.xlu0 %v1508_v0  ;;  %1383 = vset.pattern.permute.xlu1 %v1509_v1  ;;  %v1511_v6 = vmov 3   ;;  %v57_v8 = vld [vmem:[#allocation2] sm:$0x1]  ;;  %v1585_v9 = vld [vmem:[#allocation2 + $0x8] sm:$0x1]  ;;  %v1512_v14 = vmov 4  }
  0x38   :  { %1245 = vperm.xlu0 %1381, %v1241_v2   ;;  %1263 = vperm.xlu1 %1383, %v1241_v2   ;;  %v1582_v4 = vshrl.u32 %v1248_v3, 7  ;;  %v1590_v10 = vld [vmem:[%s2306_s3] sm:$0xff]  ;;  %v1593_v12 = vld [vmem:[#allocation2 + $0x10] sm:$0x1]  ;;  %v1595_v13 = vld [vmem:[#allocation2 + $0x18] sm:$0x1]  ;;  %v73_v25 = vunpack.c.l.bf16 %v57_v8  ;;  %v74_v27 = vunpack.c.l.bf16 %v1585_v9 }
  0x39   :  { %v1597_v15 = vld [vmem:[#allocation2 + $0x20] sm:$0x1]  ;;  %v66_v17 = vld [vmem:[#allocation5 + $0x8] sm:$0x1]  ;;  %v67_v18 = vld [vmem:[#allocation5 + $0x10] sm:$0x1]  ;;  %v75_v28 = vunpack.c.l.bf16 %v1593_v12  ;;  %v76_v29 = vunpack.c.l.bf16 %v1595_v13 }
  0x3a   :  { %v1250_v7 = vsub.s32 0, %v1582_v4  ;;  %v1259_v11 = vsub.s32 1, %v1582_v4  ;;  %v65_v16 = vld [vmem:[#allocation5] sm:$0x1]  ;;  %v68_v19 = vld [vmem:[#allocation5 + $0x18] sm:$0x1]  ;;  %v77_v33 = vunpack.c.l.bf16 %v1597_v15  ;;  %v90_v34 = vmul.bf16 %v66_v17, %v1585_v9 }
  0x3b   :  { %v69_v20 = vld [vmem:[#allocation5 + $0x20] sm:$0x1]  ;;  %v70_v22 = vld [vmem:[#allocation5 + $0x28] sm:$0x1]  ;;  %v71_v23 = vld [vmem:[#allocation5 + $0x30] sm:$0x1]  ;;  %v89_v30 = vmul.bf16 %v65_v16, %v57_v8  ;;  %v91_v35 = vmul.bf16 %v67_v18, %v1593_v12  ;;  %v92_v36 = vmul.bf16 %v68_v19, %v1595_v13 }
  0x3c   :  { %1382 = vset.pattern.permute.xlu0 %v1510_v5  ;;  %1384 = vset.pattern.permute.xlu1 %v1511_v6  ;;  %v1600_v21 = vrot.slane %v1590_v10, %v1250_v7  ;;  %v72_v24 = vld [vmem:[#allocation5 + $0x38] sm:$0x1]  ;;  %v62_v26 = vld [vmem:[#allocation2 + $0x28] sm:$0x1]  ;;  %v63_v31 = vld [vmem:[#allocation2 + $0x30] sm:$0x1]  ;;  %v93_v37 = vmul.bf16 %v69_v20, %v1597_v15  ;;  %v1611_v41 = vrot.slane %v1590_v10, %v1259_v11  ;;  %v98_v49 = vunpack.c.l.bf16 %v90_v34 }
  0x3d   :  { %1254 = vperm.xlu0 %1382, %v1241_v2   ;;  %1288 = vperm.xlu1 %1384, %v1241_v2   ;;  %v64_v32 = vld [vmem:[#allocation2 + $0x38] sm:$0x1]  ;;  %v94_v38 = vmul.bf16 %v70_v22, %v62_v26  ;;  %v95_v39 = vmul.bf16 %v71_v23, %v63_v31  ;;  %v1268_v42 = vsub.s32 2, %v1582_v4  ;;  %v78_v43 = vunpack.c.l.bf16 %v62_v26  ;;  %v1628_v15 = vld [vmem:[#allocation2] sm:$0x2]  ;;  %s1513_s3 = smov [#allocation8]  }
  0x3e   :  { %v96_v40 = vmul.bf16 %v72_v24, %v64_v32  ;;  %v121_v44 = vrot.slane %v73_v25, 1  ;;  %v79_v45 = vunpack.c.l.bf16 %v63_v31  ;;  %v80_v46 = vunpack.c.l.bf16 %v64_v32  ;;  %v1630_v16 = vld [vmem:[#allocation2 + $0x8] sm:$0x2]  ;;  %v1632_v17 = vld [vmem:[#allocation2 + $0x10] sm:$0x2]  ;;  %s1360_s26 = sshll.u32 %s1513_s3, 4  ;;  %s1361_s26 = int_to_ptr.vmem [resolvable:$true] %s1360_s26 }
  0x3f   :  { %v97_v47 = vunpack.c.l.bf16 %v89_v30  ;;  %v122_v48 = vrot.slane %v74_v27, 1  ;;  %v99_v50 = vunpack.c.l.bf16 %v91_v35  ;;  %v100_v51 = vunpack.c.l.bf16 %v92_v36  ;;  %v1642_v23 = vld [vmem:[#allocation2 + $0x18] sm:$0x2]  ;;  %v1644_v24 = vld [vmem:[#allocation2 + $0x20] sm:$0x2]  ;;  %s1475_s27 = scalar_lea.vmem %s1361_s26, 128  ;;  %p1480_p11 = scmp.lt.s32.totalorder %s1361_s26, %s1361_s26 }
  0x40   :  { %v123_v52 = vrot.slane %v75_v28, 1  ;;  %v101_v53 = vunpack.c.l.bf16 %v93_v37  ;;  %v102_v54 = vunpack.c.l.bf16 %v94_v38  ;;  %v103_v55 = vunpack.c.l.bf16 %v95_v39  ;;  %v1657_v30 = vld [vmem:[#allocation2 + $0x30] sm:$0x2]  ;;  %v185_v31 = vld [vmem:[#allocation5] sm:$0x2]  ;;  %p1476_p10 = scmp.ne.s32.totalorder %s1361_s26, %s1475_s27  ;;  %p1481_p12 = scmp.lt.s32.totalorder %s1475_s27, %s1475_s27 }
  0x41   :  { %1385 = vset.pattern.permute.xlu1 %v1512_v14  ;;  %1386 = vset.pattern.permute.xlu0 %v1512_v14  ;;  %v104_v56 = vunpack.c.l.bf16 %v96_v40  ;;  %v1615_v57 = vrot.slane %v1590_v10, %v1268_v42  ;;  %v124_v58 = vrot.slane %v76_v29, 1  ;;  %v125_v59 = vrot.slane %v77_v33, 1  ;;  %v186_v32 = vld [vmem:[#allocation5 + $0x8] sm:$0x2]  ;;  %v188_v38 = vld [vmem:[#allocation5 + $0x18] sm:$0x2] }
  0x42   :  { %1302 = vperm.xlu1 %1385, %v1241_v2   ;;  %v126_v60 = vrot.slane %v78_v43, 1  ;;  %v127_v61 = vrot.slane %v79_v45, 1  ;;  %v128_v62 = vrot.slane %v80_v46, 1  ;;  %v1617_v63 = vadd.f32 %v121_v44, %v73_v25  ;;  %v1646_v25 = vld [vmem:[#allocation2 + $0x28] sm:$0x2]  ;;  %p1482_p13 = por %p1481_p12, %p1480_p11 }
  0x43   :  { %v153_v0 = vrot.slane %v97_v47, 1  ;;  %v1293_v1 = vsub.s32 3, %v1582_v4  ;;  %v154_v2 = vrot.slane %v98_v49, 1  ;;  %v155_v3 = vrot.slane %v99_v50, 1  ;;  %v189_v39 = vld [vmem:[#allocation5 + $0x20] sm:$0x2] }
  0x44   :  { %v156_v5 = vrot.slane %v100_v51, 1  ;;  %v157_v6 = vrot.slane %v101_v53, 1  ;;  %v158_v7 = vrot.slane %v102_v54, 1  ;;  %v159_v8 = vrot.slane %v103_v55, 1  ;;  %v190_v40 = vld [vmem:[#allocation5 + $0x28] sm:$0x2]  ;;  %p1483_p0 = pnand %p1482_p13, %p1476_p10 }
  0x45   :  { %v160_v9 = vrot.slane %v104_v56, 1  ;;  %v1620_v11 = vadd.f32 %v122_v48, %v74_v27  ;;  %v1622_v12 = vadd.f32 %v123_v52, %v75_v28  ;;  %v1624_v13 = vadd.f32 %v124_v58, %v76_v29  ;;  %v1667_v42 = vld [vmem:[#allocation2 + $0x38] sm:$0x2] }
  0x46   :  { %v1626_v14 = vadd.f32 %v125_v59, %v77_v33  ;;  %v1634_v18 = vadd.f32 %v126_v60, %v78_v43  ;;  %v1636_v19 = vadd.f32 %v127_v61, %v79_v45  ;;  %v1638_v20 = vadd.f32 %v128_v62, %v80_v46  ;;  %v187_v33 = vld [vmem:[#allocation5 + $0x10] sm:$0x2]  ;;  %v192_v44 = vld [vmem:[#allocation5 + $0x38] sm:$0x2] }
  0x47   :  { %v1640_v22 = vadd.f32 %v153_v0, %v97_v47  ;;  %v1649_v26 = vrot.slane %v1590_v10, %v1293_v1  ;;  %v1651_v27 = vadd.f32 %v154_v2, %v98_v49  ;;  %v1653_v28 = vadd.f32 %v155_v3, %v99_v50  ;;  %v191_v43 = vld [vmem:[#allocation5 + $0x30] sm:$0x2] }
  0x48   :  { %v1655_v29 = vadd.f32 %v156_v5, %v100_v51  ;;  %v1659_v34 = vadd.f32 %v157_v6, %v101_v53  ;;  %v1661_v35 = vadd.f32 %v158_v7, %v102_v54  ;;  %v1663_v36 = vadd.f32 %v159_v8, %v103_v55 }
  0x49   :  { %v1665_v37 = vadd.f32 %v160_v9, %v104_v56  ;;  %v193_v45 = vunpack.c.l.bf16 %v1628_v15  ;;  %v194_v46 = vunpack.c.l.bf16 %v1630_v16  ;;  %v195_v47 = vunpack.c.l.bf16 %v1632_v17 }
  0x4a   :  { %v196_v48 = vunpack.c.l.bf16 %v1642_v23  ;;  %v197_v49 = vunpack.c.l.bf16 %v1644_v24  ;;  %v198_v50 = vunpack.c.l.bf16 %v1646_v25  ;;  %v233_v51 = vmul.bf16 %v185_v31, %v1628_v15 }
  0x4b   :  { %v234_v52 = vmul.bf16 %v186_v32, %v1630_v16  ;;  %v235_v53 = vmul.bf16 %v187_v33, %v1632_v17  ;;  %v236_v54 = vmul.bf16 %v188_v38, %v1642_v23  ;;  %v237_v55 = vmul.bf16 %v189_v39, %v1644_v24 }
  0x4c   :  { %v238_v56 = vmul.bf16 %v190_v40, %v1646_v25  ;;  %v199_v58 = vunpack.c.l.bf16 %v1657_v30  ;;  %v200_v59 = vunpack.c.l.bf16 %v1667_v42  ;;  %v239_v60 = vmul.bf16 %v191_v43, %v1657_v30 }
  0x4d   :  { %v240_v61 = vmul.bf16 %v192_v44, %v1667_v42  ;;  %v209_v62 = vrot.slane %v193_v45, 2  ;;  %v210_v0 = vrot.slane %v194_v46, 2  ;;  %v211_v1 = vrot.slane %v195_v47, 2 }
  0x4e   :  { %v212_v2 = vrot.slane %v196_v48, 2  ;;  %v213_v3 = vrot.slane %v197_v49, 2  ;;  %v214_v5 = vrot.slane %v198_v50, 2  ;;  %v1685_v6 = vunpack.c.l.bf16 %v233_v51 }
  0x4f   :  { %v1687_v7 = vunpack.c.l.bf16 %v234_v52  ;;  %v1689_v8 = vunpack.c.l.bf16 %v235_v53  ;;  %v1691_v9 = vunpack.c.l.bf16 %v236_v54  ;;  %v1693_v15 = vunpack.c.l.bf16 %v237_v55 }
  0x50   :  { %v1695_v16 = vunpack.c.l.bf16 %v238_v56  ;;  %v215_v17 = vrot.slane %v199_v58, 2  ;;  %v216_v23 = vrot.slane %v200_v59, 2  ;;  %v1697_v24 = vunpack.c.l.bf16 %v239_v60 }
  0x51   :  { %v1699_v25 = vunpack.c.l.bf16 %v240_v61  ;;  %v1307_v30 = vsub.s32 4, %v1582_v4  ;;  %v225_v31 = vadd.f32 %v209_v62, %v1617_v63  ;;  %v226_v32 = vadd.f32 %v210_v0, %v1620_v11 }
  0x52   :  { %v227_v33 = vadd.f32 %v211_v1, %v1622_v12  ;;  %v1312_v38 = vsub.s32 5, %v1582_v4  ;;  %v1318_v39 = vsub.s32 6, %v1582_v4  ;;  %v257_v40 = vrot.slane %v1685_v6, 2 }
  0x53   :  { %v258_v42 = vrot.slane %v1687_v7, 2  ;;  %v259_v43 = vrot.slane %v1689_v8, 2  ;;  %v260_v44 = vrot.slane %v1691_v9, 2  ;;  %v261_v51 = vrot.slane %v1693_v15, 2 }
  0x54   :  { %v262_v63 = vrot.slane %v1695_v16, 2  ;;  %v228_v11 = vadd.f32 %v212_v2, %v1624_v13  ;;  %v229_v12 = vadd.f32 %v213_v3, %v1626_v14  ;;  %v263_v52 = vrot.slane %v1697_v24, 2 }
  0x55   :  { %v264_v4 = vrot.slane %v1699_v25, 2  ;;  %v1718_v53 = vrot.slane %v1590_v10, %v1307_v30  ;;  %v230_v54 = vadd.f32 %v214_v5, %v1634_v18  ;;  %v231_v55 = vadd.f32 %v215_v17, %v1636_v19 }
  0x56   :  { %v232_v56 = vadd.f32 %v216_v23, %v1638_v20  ;;  %v1724_v60 = vrot.slane %v1590_v10, %v1312_v38  ;;  %v1727_v13 = vrot.slane %v1590_v10, %v1318_v39  ;;  %v273_v14 = vadd.f32 %v257_v40, %v1640_v22 }
  0x57   :  { %v274_v61 = vadd.f32 %v258_v42, %v1651_v27  ;;  %v275_v62 = vadd.f32 %v259_v43, %v1653_v28  ;;  %v276_v0 = vadd.f32 %v260_v44, %v1655_v29  ;;  %v277_v18 = vadd.f32 %v261_v51, %v1659_v34  ;;  %v1777_v43 = vld [vmem:[#allocation2 + $0x10] sm:$0x4]  ;;  %v344_v51 = vld [vmem:[#allocation5 + $0x38] sm:$0x4] }
  0x58   :  { %2308 = vst [vmem:[#allocation12_spill] sm:$0xff] %v1727_v13  ;;  %v278_v19 = vadd.f32 %v262_v63, %v1661_v35  ;;  %v279_v20 = vadd.f32 %v263_v52, %v1663_v36  ;;  %v280_v1 = vadd.f32 %v264_v4, %v1665_v37  ;;  %v281_v2 = vrot.slane %v193_v45, 3  ;;  %v343_v44 = vld [vmem:[#allocation5 + $0x30] sm:$0x4]  ;;  %v1781_v52 = vld [vmem:[#allocation2 + $0x20] sm:$0x4] }
  0x59   :  { %v282_v3 = vrot.slane %v194_v46, 3  ;;  %v283_v10 = vrot.slane %v195_v47, 3  ;;  %v284_v5 = vrot.slane %v196_v48, 3  ;;  %v285_v17 = vrot.slane %v197_v49, 3  ;;  %v1783_v4 = vld [vmem:[#allocation2 + $0x28] sm:$0x4] }
  0x5a   :  { %v286_v22 = vrot.slane %v198_v50, 3  ;;  %v287_v23 = vrot.slane %v199_v58, 3  ;;  %v288_v27 = vrot.slane %v200_v59, 3  ;;  %v305_v28 = vrot.slane %v1685_v6, 3  ;;  %v1757_v6 = vld [vmem:[#allocation2] sm:$0x4] }
  0x5b   :  { %v306_v29 = vrot.slane %v1687_v7, 3  ;;  %v307_v34 = vrot.slane %v1689_v8, 3  ;;  %v308_v35 = vrot.slane %v1691_v9, 3  ;;  %v309_v36 = vrot.slane %v1693_v15, 3  ;;  %v1759_v7 = vld [vmem:[#allocation2 + $0x8] sm:$0x4] }
  0x5c   :  { %v310_v37 = vrot.slane %v1695_v16, 3  ;;  %v1743_v45 = vadd.f32 %v281_v2, %v225_v31  ;;  %v1745_v46 = vadd.f32 %v282_v3, %v226_v32  ;;  %v311_v47 = vrot.slane %v1697_v24, 3  ;;  %v337_v8 = vld [vmem:[#allocation5] sm:$0x4]  ;;  %v338_v9 = vld [vmem:[#allocation5 + $0x8] sm:$0x4] }
  0x5d   :  { %v312_v48 = vrot.slane %v1699_v25, 3  ;;  %v1749_v49 = vadd.f32 %v283_v10, %v227_v33  ;;  %v1751_v50 = vadd.f32 %v284_v5, %v228_v11  ;;  %v1753_v58 = vadd.f32 %v285_v17, %v229_v12  ;;  %v339_v15 = vld [vmem:[#allocation5 + $0x10] sm:$0x4]  ;;  %v340_v31 = vld [vmem:[#allocation5 + $0x18] sm:$0x4] }
  0x5e   :  { %v1755_v59 = vadd.f32 %v286_v22, %v230_v54  ;;  %v1761_v16 = vadd.f32 %v287_v23, %v231_v55  ;;  %v1763_v24 = vadd.f32 %v288_v27, %v232_v56  ;;  %v1765_v25 = vadd.f32 %v305_v28, %v273_v14  ;;  %v341_v32 = vld [vmem:[#allocation5 + $0x20] sm:$0x4]  ;;  %v342_v33 = vld [vmem:[#allocation5 + $0x28] sm:$0x4]  ;;  %v1779_v12 = vld [vmem:[#allocation2 + $0x18] sm:$0x4] }
  0x5f   :  { %v1767_v30 = vadd.f32 %v306_v29, %v274_v61  ;;  %v1769_v38 = vadd.f32 %v307_v34, %v275_v62  ;;  %v1771_v39 = vadd.f32 %v308_v35, %v276_v0  ;;  %v1773_v40 = vadd.f32 %v309_v36, %v277_v18  ;;  %v335_v56 = vld [vmem:[#allocation2 + $0x30] sm:$0x4]  ;;  %v336_v14 = vld [vmem:[#allocation2 + $0x38] sm:$0x4]  ;;  %v1072_v13 = vld [vmem:[#allocation5 + $0x3c] sm:$0x8] }
  0x60   :  { %v1775_v42 = vadd.f32 %v310_v37, %v278_v19  ;;  %v327_v63 = vadd.f32 %v311_v47, %v279_v20  ;;  %v328_v11 = vadd.f32 %v312_v48, %v280_v1  ;;  %v385_v54 = vmul.bf16 %v337_v8, %v1757_v6 }
  0x61   :  { %v386_v55 = vmul.bf16 %v338_v9, %v1759_v7  ;;  %v387_v61 = vmul.bf16 %v339_v15, %v1777_v43  ;;  %v388_v62 = vmul.bf16 %v340_v31, %v1779_v12  ;;  %v389_v0 = vmul.bf16 %v341_v32, %v1781_v52 }
  0x62   :  { %v390_v18 = vmul.bf16 %v342_v33, %v1783_v4  ;;  %v345_v19 = vunpack.c.l.bf16 %v1757_v6  ;;  %v346_v20 = vunpack.c.l.bf16 %v1759_v7  ;;  %v391_v1 = vmul.bf16 %v343_v44, %v335_v56 }
  0x63   :  { %v392_v2 = vmul.bf16 %v344_v51, %v336_v14  ;;  %v347_v3 = vunpack.c.l.bf16 %v1777_v43  ;;  %v348_v10 = vunpack.c.l.bf16 %v1779_v12  ;;  %v349_v5 = vunpack.c.l.bf16 %v1781_v52 }
  0x64   :  { %v350_v17 = vunpack.c.l.bf16 %v1783_v4  ;;  %v351_v22 = vunpack.c.l.bf16 %v335_v56  ;;  %v352_v23 = vunpack.c.l.bf16 %v336_v14  ;;  %v1797_v27 = vunpack.c.l.bf16 %v385_v54 }
  0x65   :  { %v1799_v28 = vunpack.c.l.bf16 %v386_v55  ;;  %v1801_v29 = vunpack.c.l.bf16 %v387_v61  ;;  %v1803_v34 = vunpack.c.l.bf16 %v388_v62  ;;  %v1805_v35 = vunpack.c.l.bf16 %v389_v0 }
  0x66   :  { %v1807_v36 = vunpack.c.l.bf16 %v390_v18  ;;  %v361_v37 = vrot.slane %v345_v19, 4  ;;  %v362_v47 = vrot.slane %v346_v20, 4  ;;  %v1809_v48 = vunpack.c.l.bf16 %v391_v1 }
  0x67   :  { %v1811_v6 = vunpack.c.l.bf16 %v392_v2  ;;  %v363_v7 = vrot.slane %v347_v3, 4  ;;  %v364_v8 = vrot.slane %v348_v10, 4  ;;  %v365_v9 = vrot.slane %v349_v5, 4 }
  0x68   :  { %v366_v15 = vrot.slane %v350_v17, 4  ;;  %v367_v31 = vrot.slane %v351_v22, 4  ;;  %v368_v32 = vrot.slane %v352_v23, 4  ;;  %v409_v33 = vrot.slane %v1797_v27, 4 }
  0x69   :  { %v410_v43 = vrot.slane %v1799_v28, 4  ;;  %v411_v44 = vrot.slane %v1801_v29, 4  ;;  %v412_v51 = vrot.slane %v1803_v34, 4  ;;  %v413_v12 = vrot.slane %v1805_v35, 4 }
  0x6a   :  { %v414_v52 = vrot.slane %v1807_v36, 4  ;;  %v377_v4 = vadd.f32 %v361_v37, %v1743_v45  ;;  %v378_v54 = vadd.f32 %v362_v47, %v1745_v46  ;;  %v415_v55 = vrot.slane %v1809_v48, 4 }
  0x6b   :  { %v416_v56 = vrot.slane %v1811_v6, 4  ;;  %v379_v14 = vadd.f32 %v363_v7, %v1749_v49  ;;  %v380_v61 = vadd.f32 %v364_v8, %v1751_v50  ;;  %v381_v62 = vadd.f32 %v365_v9, %v1753_v58 }
  0x6c   :  { %v382_v0 = vadd.f32 %v366_v15, %v1755_v59  ;;  %v383_v18 = vadd.f32 %v367_v31, %v1761_v16  ;;  %v384_v1 = vadd.f32 %v368_v32, %v1763_v24  ;;  %v425_v45 = vadd.f32 %v409_v33, %v1765_v25  ;;  %v492_v31 = vld [vmem:[#allocation5 + $0x18] sm:$0x8]  ;;  %v493_v32 = vld [vmem:[#allocation5 + $0x20] sm:$0x8]  ;;  %v494_v33 = vld [vmem:[#allocation5 + $0x28] sm:$0x8] }
  0x6d   :  { %v426_v46 = vadd.f32 %v410_v43, %v1767_v30  ;;  %v427_v2 = vadd.f32 %v411_v44, %v1769_v38  ;;  %v428_v37 = vadd.f32 %v412_v51, %v1771_v39  ;;  %v429_v49 = vadd.f32 %v413_v12, %v1773_v40 }
  0x6e   :  { %v430_v50 = vadd.f32 %v414_v52, %v1775_v42  ;;  %v431_v47 = vadd.f32 %v415_v55, %v327_v63  ;;  %v432_v58 = vadd.f32 %v416_v56, %v328_v11  ;;  %v433_v7 = vrot.slane %v345_v19, 5  ;;  %v1875_v52 = vld [vmem:[#allocation2 + $0x10] sm:$0x8] }
  0x6f   :  { %v434_v59 = vrot.slane %v346_v20, 5  ;;  %v435_v8 = vrot.slane %v347_v3, 5  ;;  %v436_v16 = vrot.slane %v348_v10, 5  ;;  %v437_v9 = vrot.slane %v349_v5, 5 }
  0x70   :  { %v438_v24 = vrot.slane %v350_v17, 5  ;;  %v439_v15 = vrot.slane %v351_v22, 5  ;;  %v440_v25 = vrot.slane %v352_v23, 5  ;;  %v457_v30 = vrot.slane %v1797_v27, 5  ;;  %v1855_v23 = vld [vmem:[#allocation2] sm:$0x8] }
  0x71   :  { %v458_v38 = vrot.slane %v1799_v28, 5  ;;  %v459_v39 = vrot.slane %v1801_v29, 5  ;;  %v460_v40 = vrot.slane %v1803_v34, 5  ;;  %v461_v42 = vrot.slane %v1805_v35, 5  ;;  %v1857_v27 = vld [vmem:[#allocation2 + $0x8] sm:$0x8] }
  0x72   :  { %v462_v63 = vrot.slane %v1807_v36, 5  ;;  %v1841_v11 = vadd.f32 %v433_v7, %v377_v4  ;;  %v1843_v19 = vadd.f32 %v434_v59, %v378_v54  ;;  %v463_v20 = vrot.slane %v1809_v48, 5  ;;  %v489_v28 = vld [vmem:[#allocation5] sm:$0x8]  ;;  %v490_v29 = vld [vmem:[#allocation5 + $0x8] sm:$0x8] }
  0x73   :  { %v464_v3 = vrot.slane %v1811_v6, 5  ;;  %v1847_v10 = vadd.f32 %v435_v8, %v379_v14  ;;  %v1849_v5 = vadd.f32 %v436_v16, %v380_v61  ;;  %v1851_v17 = vadd.f32 %v437_v9, %v381_v62  ;;  %v491_v34 = vld [vmem:[#allocation5 + $0x10] sm:$0x8]  ;;  %v496_v54 = vld [vmem:[#allocation5 + $0x38] sm:$0x8] }
  0x74   :  { %v1853_v22 = vadd.f32 %v438_v24, %v382_v0  ;;  %v1859_v35 = vadd.f32 %v439_v15, %v383_v18  ;;  %v1861_v36 = vadd.f32 %v440_v25, %v384_v1  ;;  %v1863_v48 = vadd.f32 %v457_v30, %v425_v45  ;;  %v495_v4 = vld [vmem:[#allocation5 + $0x30] sm:$0x8]  ;;  %v1877_v14 = vld [vmem:[#allocation2 + $0x18] sm:$0x8]  ;;  %v1879_v61 = vld [vmem:[#allocation2 + $0x20] sm:$0x8] }
  0x75   :  { %v1865_v6 = vadd.f32 %v458_v38, %v426_v46  ;;  %v1867_v43 = vadd.f32 %v459_v39, %v427_v2  ;;  %v1869_v44 = vadd.f32 %v460_v40, %v428_v37  ;;  %v1871_v51 = vadd.f32 %v461_v42, %v429_v49  ;;  %v1881_v62 = vld [vmem:[#allocation2 + $0x28] sm:$0x8]  ;;  %v487_v1 = vld [vmem:[#allocation2 + $0x30] sm:$0x8]  ;;  %v488_v45 = vld [vmem:[#allocation2 + $0x38] sm:$0x8] }
  0x76   :  { %v1873_v12 = vadd.f32 %v462_v63, %v430_v50  ;;  %v479_v55 = vadd.f32 %v463_v20, %v431_v47  ;;  %v480_v56 = vadd.f32 %v464_v3, %v432_v58  ;;  %v537_v0 = vmul.bf16 %v489_v28, %v1855_v23 }
  0x77   :  { %v538_v18 = vmul.bf16 %v490_v29, %v1857_v27  ;;  %v539_v46 = vmul.bf16 %v491_v34, %v1875_v52  ;;  %v540_v2 = vmul.bf16 %v492_v31, %v1877_v14  ;;  %v541_v37 = vmul.bf16 %v493_v32, %v1879_v61 }
  0x78   :  { %v542_v49 = vmul.bf16 %v494_v33, %v1881_v62  ;;  %v497_v50 = vunpack.c.l.bf16 %v1855_v23  ;;  %v498_v47 = vunpack.c.l.bf16 %v1857_v27  ;;  %v543_v58 = vmul.bf16 %v495_v4, %v487_v1 }
  0x79   :  { %v544_v7 = vmul.bf16 %v496_v54, %v488_v45  ;;  %v499_v59 = vunpack.c.l.bf16 %v1875_v52  ;;  %v500_v8 = vunpack.c.l.bf16 %v1877_v14  ;;  %v501_v16 = vunpack.c.l.bf16 %v1879_v61 }
  0x7a   :  { %v502_v9 = vunpack.c.l.bf16 %v1881_v62  ;;  %v503_v24 = vunpack.c.l.bf16 %v487_v1  ;;  %v504_v15 = vunpack.c.l.bf16 %v488_v45  ;;  %v1895_v25 = vunpack.c.l.bf16 %v537_v0 }
  0x7b   :  { %v1897_v30 = vunpack.c.l.bf16 %v538_v18  ;;  %v1899_v38 = vunpack.c.l.bf16 %v539_v46  ;;  %v1901_v39 = vunpack.c.l.bf16 %v540_v2  ;;  %v1903_v40 = vunpack.c.l.bf16 %v541_v37 }
  0x7c   :  { %v1905_v42 = vunpack.c.l.bf16 %v542_v49  ;;  %v513_v63 = vrot.slane %v497_v50, 6  ;;  %v514_v20 = vrot.slane %v498_v47, 6  ;;  %v1907_v3 = vunpack.c.l.bf16 %v543_v58 }
  0x7d   :  { %v1909_v23 = vunpack.c.l.bf16 %v544_v7  ;;  %v515_v27 = vrot.slane %v499_v59, 6  ;;  %v516_v28 = vrot.slane %v500_v8, 6  ;;  %v517_v29 = vrot.slane %v501_v16, 6 }
  0x7e   :  { %v518_v34 = vrot.slane %v502_v9, 6  ;;  %v519_v31 = vrot.slane %v503_v24, 6  ;;  %v520_v32 = vrot.slane %v504_v15, 6  ;;  %v561_v33 = vrot.slane %v1895_v25, 6 }
  0x7f   :  { %v562_v52 = vrot.slane %v1897_v30, 6  ;;  %v563_v4 = vrot.slane %v1899_v38, 6  ;;  %v564_v54 = vrot.slane %v1901_v39, 6  ;;  %v565_v14 = vrot.slane %v1903_v40, 6 }
  0x80   :  { %v566_v61 = vrot.slane %v1905_v42, 6  ;;  %v529_v62 = vadd.f32 %v513_v63, %v1841_v11  ;;  %v530_v0 = vadd.f32 %v514_v20, %v1843_v19  ;;  %v567_v18 = vrot.slane %v1907_v3, 6 }
  0x81   :  { %v568_v1 = vrot.slane %v1909_v23, 6  ;;  %v531_v45 = vadd.f32 %v515_v27, %v1847_v10  ;;  %v532_v46 = vadd.f32 %v516_v28, %v1849_v5  ;;  %v533_v2 = vadd.f32 %v517_v29, %v1851_v17 }
  0x82   :  { %v534_v37 = vadd.f32 %v518_v34, %v1853_v22  ;;  %v535_v49 = vadd.f32 %v519_v31, %v1859_v35  ;;  %v536_v58 = vadd.f32 %v520_v32, %v1861_v36  ;;  %v577_v11 = vadd.f32 %v561_v33, %v1863_v48  ;;  %v644_v33 = vld [vmem:[#allocation5 + $0x1c] sm:$0x1] }
  0x83   :  { %v578_v19 = vadd.f32 %v562_v52, %v1865_v6  ;;  %v579_v7 = vadd.f32 %v563_v4, %v1867_v43  ;;  %v580_v63 = vadd.f32 %v564_v54, %v1869_v44  ;;  %v581_v10 = vadd.f32 %v565_v14, %v1871_v51  ;;  %v645_v52 = vld [vmem:[#allocation5 + $0x24] sm:$0x1] }
  0x84   :  { %v582_v5 = vadd.f32 %v566_v61, %v1873_v12  ;;  %v583_v20 = vadd.f32 %v567_v18, %v479_v55  ;;  %v584_v17 = vadd.f32 %v568_v1, %v480_v56  ;;  %v585_v27 = vrot.slane %v497_v50, 7  ;;  %v635_v61 = vld [vmem:[#allocation2 + $0x14] sm:$0x1] }
  0x85   :  { %v586_v22 = vrot.slane %v498_v47, 7  ;;  %v587_v28 = vrot.slane %v499_v59, 7  ;;  %v588_v35 = vrot.slane %v500_v8, 7  ;;  %v589_v29 = vrot.slane %v501_v16, 7 }
  0x86   :  { %v590_v36 = vrot.slane %v502_v9, 7  ;;  %v591_v34 = vrot.slane %v503_v24, 7  ;;  %v592_v48 = vrot.slane %v504_v15, 7  ;;  %v609_v6 = vrot.slane %v1895_v25, 7  ;;  %v1941_v15 = vld [vmem:[#allocation2 + $0x4] sm:$0x1] }
  0x87   :  { %v610_v43 = vrot.slane %v1897_v30, 7  ;;  %v611_v44 = vrot.slane %v1899_v38, 7  ;;  %v612_v51 = vrot.slane %v1901_v39, 7  ;;  %v613_v12 = vrot.slane %v1903_v40, 7  ;;  %v1943_v25 = vld [vmem:[#allocation2 + $0xc] sm:$0x1] }
  0x88   :  { %v614_v55 = vrot.slane %v1905_v42, 7  ;;  %v601_v56 = vadd.f32 %v585_v27, %v529_v62  ;;  %v602_v50 = vadd.f32 %v586_v22, %v530_v0  ;;  %v615_v47 = vrot.slane %v1907_v3, 7  ;;  %v641_v30 = vld [vmem:[#allocation5 + $0x4] sm:$0x1]  ;;  %v642_v38 = vld [vmem:[#allocation5 + $0xc] sm:$0x1] }
  0x89   :  { %v616_v59 = vrot.slane %v1909_v23, 7  ;;  %v603_v8 = vadd.f32 %v587_v28, %v531_v45  ;;  %v604_v16 = vadd.f32 %v588_v35, %v532_v46  ;;  %v605_v9 = vadd.f32 %v589_v29, %v533_v2  ;;  %v643_v39 = vld [vmem:[#allocation5 + $0x14] sm:$0x1]  ;;  %v646_v3 = vld [vmem:[#allocation5 + $0x2c] sm:$0x1] }
  0x8a   :  { %v606_v24 = vadd.f32 %v590_v36, %v534_v37  ;;  %v607_v40 = vadd.f32 %v591_v34, %v535_v49  ;;  %v608_v31 = vadd.f32 %v592_v48, %v536_v58  ;;  %v625_v42 = vadd.f32 %v609_v6, %v577_v11  ;;  %v647_v62 = vld [vmem:[#allocation5 + $0x34] sm:$0x1]  ;;  %v648_v0 = vld [vmem:[#allocation5 + $0x3c] sm:$0x1]  ;;  %v637_v46 = vld [vmem:[#allocation2 + $0x24] sm:$0x1] }
  0x8b   :  { %v626_v32 = vadd.f32 %v610_v43, %v578_v19  ;;  %v627_v4 = vadd.f32 %v611_v44, %v579_v7  ;;  %v628_v23 = vadd.f32 %v612_v51, %v580_v63  ;;  %v629_v54 = vadd.f32 %v613_v12, %v581_v10  ;;  %v636_v45 = vld [vmem:[#allocation2 + $0x1c] sm:$0x1]  ;;  %v638_v2 = vld [vmem:[#allocation2 + $0x2c] sm:$0x1]  ;;  %v639_v58 = vld [vmem:[#allocation2 + $0x34] sm:$0x1] }
  0x8c   :  { %v630_v14 = vadd.f32 %v614_v55, %v582_v5  ;;  %v631_v18 = vadd.f32 %v615_v47, %v583_v20  ;;  %v632_v1 = vadd.f32 %v616_v59, %v584_v17  ;;  %v665_v37 = vmul.bf16 %v641_v30, %v1941_v15  ;;  %v640_v11 = vld [vmem:[#allocation2 + $0x3c] sm:$0x1] }
  0x8d   :  { %v666_v49 = vmul.bf16 %v642_v38, %v1943_v25  ;;  %v667_v19 = vmul.bf16 %v643_v39, %v635_v61  ;;  %v668_v27 = vmul.bf16 %v644_v33, %v636_v45  ;;  %v669_v7 = vmul.bf16 %v645_v52, %v637_v46 }
  0x8e   :  { %v670_v63 = vmul.bf16 %v646_v3, %v638_v2  ;;  %v649_v10 = vunpack.c.l.bf16 %v1941_v15  ;;  %v650_v5 = vunpack.c.l.bf16 %v1943_v25  ;;  %v671_v22 = vmul.bf16 %v647_v62, %v639_v58 }
  0x8f   :  { %v672_v20 = vmul.bf16 %v648_v0, %v640_v11  ;;  %v651_v17 = vunpack.c.l.bf16 %v635_v61  ;;  %v652_v28 = vunpack.c.l.bf16 %v636_v45  ;;  %v653_v35 = vunpack.c.l.bf16 %v637_v46 }
  0x90   :  { %v654_v29 = vunpack.c.l.bf16 %v638_v2  ;;  %v655_v36 = vunpack.c.l.bf16 %v639_v58  ;;  %v656_v34 = vunpack.c.l.bf16 %v640_v11  ;;  %v673_v48 = vunpack.c.l.bf16 %v665_v37 }
  0x91   :  { %v674_v6 = vunpack.c.l.bf16 %v666_v49  ;;  %v675_v43 = vunpack.c.l.bf16 %v667_v19  ;;  %v676_v44 = vunpack.c.l.bf16 %v668_v27  ;;  %v677_v51 = vunpack.c.l.bf16 %v669_v7 }
  0x92   :  { %v678_v12 = vunpack.c.l.bf16 %v670_v63  ;;  %v657_v55 = vadd.f32 %v649_v10, %v601_v56  ;;  %v658_v47 = vadd.f32 %v650_v5, %v602_v50  ;;  %v679_v59 = vunpack.c.l.bf16 %v671_v22  ;;  %v761_v22 = vld [vmem:[#allocation5 + $0x4] sm:$0x2] }
  0x93   :  { %v680_v15 = vunpack.c.l.bf16 %v672_v20  ;;  %v659_v30 = vadd.f32 %v651_v17, %v603_v8  ;;  %v660_v25 = vadd.f32 %v652_v28, %v604_v16  ;;  %v661_v38 = vadd.f32 %v653_v35, %v605_v9 }
  0x94   :  { %v662_v39 = vadd.f32 %v654_v29, %v606_v24  ;;  %v663_v33 = vadd.f32 %v655_v36, %v607_v40  ;;  %v664_v52 = vadd.f32 %v656_v34, %v608_v31  ;;  %v681_v3 = vadd.f32 %v673_v48, %v625_v42 }
  0x95   :  { %v682_v61 = vadd.f32 %v674_v6, %v626_v32  ;;  %v683_v62 = vadd.f32 %v675_v43, %v627_v4  ;;  %v684_v0 = vadd.f32 %v676_v44, %v628_v23  ;;  %v685_v45 = vadd.f32 %v677_v51, %v629_v54 }
  0x96   :  { %v686_v46 = vadd.f32 %v678_v12, %v630_v14  ;;  %v687_v2 = vadd.f32 %v679_v59, %v631_v18  ;;  %v688_v37 = vadd.f32 %v680_v15, %v632_v1  ;;  %v697_v49 = vrot.slane %v649_v10, 1  ;;  %v1953_v18 = vld [vmem:[#allocation2 + $0x4] sm:$0x2]  ;;  %v1963_v10 = vld [vmem:[#allocation2 + $0xc] sm:$0x2] }
  0x97   :  { %v698_v58 = vrot.slane %v650_v5, 1  ;;  %v699_v56 = vrot.slane %v651_v17, 1  ;;  %v700_v50 = vrot.slane %v652_v28, 1  ;;  %v701_v11 = vrot.slane %v653_v35, 1  ;;  %v1965_v5 = vld [vmem:[#allocation2 + $0x14] sm:$0x2] }
  0x98   :  { %v702_v19 = vrot.slane %v654_v29, 1  ;;  %v703_v8 = vrot.slane %v655_v36, 1  ;;  %v704_v16 = vrot.slane %v656_v34, 1  ;;  %v729_v9 = vrot.slane %v673_v48, 1  ;;  %v1975_v29 = vld [vmem:[#allocation2 + $0x1c] sm:$0x2] }
  0x99   :  { %v730_v24 = vrot.slane %v674_v6, 1  ;;  %v731_v40 = vrot.slane %v675_v43, 1  ;;  %v732_v31 = vrot.slane %v676_v44, 1  ;;  %v733_v42 = vrot.slane %v677_v51, 1  ;;  %v762_v36 = vld [vmem:[#allocation5 + $0xc] sm:$0x2] }
  0x9a   :  { %v734_v32 = vrot.slane %v678_v12, 1  ;;  %v1949_v4 = vadd.f32 %v697_v49, %v657_v55  ;;  %v1951_v23 = vadd.f32 %v698_v58, %v658_v47  ;;  %v735_v54 = vrot.slane %v679_v59, 1  ;;  %v763_v34 = vld [vmem:[#allocation5 + $0x14] sm:$0x2]  ;;  %v764_v48 = vld [vmem:[#allocation5 + $0x1c] sm:$0x2] }
  0x9b   :  { %v736_v14 = vrot.slane %v680_v15, 1  ;;  %v1955_v1 = vadd.f32 %v699_v56, %v659_v30  ;;  %v1957_v27 = vadd.f32 %v700_v50, %v660_v25  ;;  %v1959_v7 = vadd.f32 %v701_v11, %v661_v38  ;;  %v765_v12 = vld [vmem:[#allocation5 + $0x24] sm:$0x2]  ;;  %v766_v55 = vld [vmem:[#allocation5 + $0x2c] sm:$0x2] }
  0x9c   :  { %v1961_v63 = vadd.f32 %v702_v19, %v662_v39  ;;  %v1967_v20 = vadd.f32 %v703_v8, %v663_v33  ;;  %v1969_v17 = vadd.f32 %v704_v16, %v664_v52  ;;  %v1971_v28 = vadd.f32 %v729_v9, %v681_v3  ;;  %v767_v47 = vld [vmem:[#allocation5 + $0x34] sm:$0x2]  ;;  %v1989_v30 = vld [vmem:[#allocation2 + $0x24] sm:$0x2]  ;;  %v1991_v25 = vld [vmem:[#allocation2 + $0x2c] sm:$0x2] }
  0x9d   :  { %v1973_v35 = vadd.f32 %v730_v24, %v682_v61  ;;  %v1977_v6 = vadd.f32 %v731_v40, %v683_v62  ;;  %v1979_v43 = vadd.f32 %v732_v31, %v684_v0  ;;  %v1981_v44 = vadd.f32 %v733_v42, %v685_v45  ;;  %v768_v38 = vld [vmem:[#allocation5 + $0x3c] sm:$0x2]  ;;  %v1995_v52 = vld [vmem:[#allocation2 + $0x34] sm:$0x2] }
  0x9e   :  { %v1983_v51 = vadd.f32 %v734_v32, %v686_v46  ;;  %v1985_v59 = vadd.f32 %v735_v54, %v687_v2  ;;  %v1987_v15 = vadd.f32 %v736_v14, %v688_v37  ;;  %v769_v39 = vunpack.c.l.bf16 %v1953_v18  ;;  %v1997_v3 = vld [vmem:[#allocation2 + $0x3c] sm:$0x2] }
  0x9f   :  { %v770_v33 = vunpack.c.l.bf16 %v1963_v10  ;;  %v771_v61 = vunpack.c.l.bf16 %v1965_v5  ;;  %v809_v62 = vmul.bf16 %v761_v22, %v1953_v18  ;;  %v810_v0 = vmul.bf16 %v762_v36, %v1963_v10 }
  0xa0   :  { %v811_v45 = vmul.bf16 %v763_v34, %v1965_v5  ;;  %v812_v46 = vmul.bf16 %v764_v48, %v1975_v29  ;;  %v813_v2 = vmul.bf16 %v765_v12, %v1989_v30  ;;  %v814_v37 = vmul.bf16 %v766_v55, %v1991_v25 }
  0xa1   :  { %v815_v49 = vmul.bf16 %v767_v47, %v1995_v52  ;;  %v772_v58 = vunpack.c.l.bf16 %v1975_v29  ;;  %v773_v56 = vunpack.c.l.bf16 %v1989_v30  ;;  %v774_v50 = vunpack.c.l.bf16 %v1991_v25 }
  0xa2   :  { %v816_v11 = vmul.bf16 %v768_v38, %v1997_v3  ;;  %v775_v19 = vunpack.c.l.bf16 %v1995_v52  ;;  %v776_v8 = vunpack.c.l.bf16 %v1997_v3  ;;  %v785_v16 = vrot.slane %v769_v39, 2 }
  0xa3   :  { %v786_v9 = vrot.slane %v770_v33, 2  ;;  %v787_v24 = vrot.slane %v771_v61, 2  ;;  %v2013_v40 = vunpack.c.l.bf16 %v809_v62  ;;  %v2015_v31 = vunpack.c.l.bf16 %v810_v0 }
  0xa4   :  { %v2017_v42 = vunpack.c.l.bf16 %v811_v45  ;;  %v2019_v32 = vunpack.c.l.bf16 %v812_v46  ;;  %v2021_v54 = vunpack.c.l.bf16 %v813_v2  ;;  %v2023_v14 = vunpack.c.l.bf16 %v814_v37 }
  0xa5   :  { %v2025_v18 = vunpack.c.l.bf16 %v815_v49  ;;  %v788_v10 = vrot.slane %v772_v58, 2  ;;  %v789_v5 = vrot.slane %v773_v56, 2  ;;  %v790_v22 = vrot.slane %v774_v50, 2 }
  0xa6   :  { %v2027_v29 = vunpack.c.l.bf16 %v816_v11  ;;  %v791_v36 = vrot.slane %v775_v19, 2  ;;  %v792_v34 = vrot.slane %v776_v8, 2  ;;  %v801_v48 = vadd.f32 %v785_v16, %v1949_v4 }
  0xa7   :  { %v802_v12 = vadd.f32 %v786_v9, %v1951_v23  ;;  %v803_v55 = vadd.f32 %v787_v24, %v1955_v1  ;;  %v833_v47 = vrot.slane %v2013_v40, 2  ;;  %v834_v30 = vrot.slane %v2015_v31, 2 }
  0xa8   :  { %v835_v25 = vrot.slane %v2017_v42, 2  ;;  %v836_v38 = vrot.slane %v2019_v32, 2  ;;  %v837_v52 = vrot.slane %v2021_v54, 2  ;;  %v838_v3 = vrot.slane %v2023_v14, 2 }
  0xa9   :  { %v839_v62 = vrot.slane %v2025_v18, 2  ;;  %v804_v4 = vadd.f32 %v788_v10, %v1957_v27  ;;  %v805_v23 = vadd.f32 %v789_v5, %v1959_v7  ;;  %v806_v1 = vadd.f32 %v790_v22, %v1961_v63 }
  0xaa   :  { %v840_v0 = vrot.slane %v2027_v29, 2  ;;  %v807_v45 = vadd.f32 %v791_v36, %v1967_v20  ;;  %v808_v46 = vadd.f32 %v792_v34, %v1969_v17  ;;  %v857_v2 = vrot.slane %v769_v39, 3 }
  0xab   :  { %v858_v37 = vrot.slane %v770_v33, 3  ;;  %v849_v49 = vadd.f32 %v833_v47, %v1971_v28  ;;  %v850_v11 = vadd.f32 %v834_v30, %v1973_v35  ;;  %v851_v16 = vadd.f32 %v835_v25, %v1977_v6 }
  0xac   :  { %v859_v9 = vrot.slane %v771_v61, 3  ;;  %v852_v27 = vadd.f32 %v836_v38, %v1979_v43  ;;  %v853_v7 = vadd.f32 %v837_v52, %v1981_v44  ;;  %v854_v63 = vadd.f32 %v838_v3, %v1983_v51  ;;  %v2102_v38 = vld [vmem:[#allocation2 + $0x24] sm:$0x4]  ;;  %v2104_v52 = vld [vmem:[#allocation2 + $0x2c] sm:$0x4] }
  0xad   :  { %v855_v24 = vadd.f32 %v839_v62, %v1985_v59  ;;  %v856_v17 = vadd.f32 %v840_v0, %v1987_v15  ;;  %v860_v39 = vrot.slane %v772_v58, 3  ;;  %v861_v33 = vrot.slane %v773_v56, 3  ;;  %v913_v3 = vld [vmem:[#allocation5 + $0x4] sm:$0x4]  ;;  %v915_v0 = vld [vmem:[#allocation5 + $0x14] sm:$0x4] }
  0xae   :  { %v862_v10 = vrot.slane %v774_v50, 3  ;;  %v863_v5 = vrot.slane %v775_v19, 3  ;;  %v864_v35 = vrot.slane %v776_v8, 3  ;;  %v2053_v22 = vadd.f32 %v857_v2, %v801_v48  ;;  %v2088_v48 = vld [vmem:[#allocation2 + $0xc] sm:$0x4] }
  0xaf   :  { %v2055_v6 = vadd.f32 %v858_v37, %v802_v12  ;;  %v2057_v43 = vadd.f32 %v859_v9, %v803_v55  ;;  %v881_v44 = vrot.slane %v2013_v40, 3  ;;  %v882_v51 = vrot.slane %v2015_v31, 3  ;;  %v2090_v12 = vld [vmem:[#allocation2 + $0x14] sm:$0x4]  ;;  %v2092_v55 = vld [vmem:[#allocation2 + $0x1c] sm:$0x4] }
  0xb0   :  { %v883_v59 = vrot.slane %v2017_v42, 3  ;;  %v884_v15 = vrot.slane %v2019_v32, 3  ;;  %v885_v61 = vrot.slane %v2021_v54, 3  ;;  %v886_v58 = vrot.slane %v2023_v14, 3  ;;  %v2079_v14 = vld [vmem:[#allocation2 + $0x4] sm:$0x4] }
  0xb1   :  { %v887_v56 = vrot.slane %v2025_v18, 3  ;;  %v2068_v8 = vadd.f32 %v860_v39, %v804_v4  ;;  %v2070_v36 = vadd.f32 %v861_v33, %v805_v23  ;;  %v2072_v31 = vadd.f32 %v862_v10, %v806_v1  ;;  %v914_v1 = vld [vmem:[#allocation5 + $0xc] sm:$0x4]  ;;  %v2109_v37 = vld [vmem:[#allocation2 + $0x34] sm:$0x4] }
  0xb2   :  { %v2074_v42 = vadd.f32 %v863_v5, %v807_v45  ;;  %v2076_v32 = vadd.f32 %v864_v35, %v808_v46  ;;  %v888_v54 = vrot.slane %v2027_v29, 3  ;;  %v2086_v34 = vadd.f32 %v883_v59, %v851_v16  ;;  %v916_v45 = vld [vmem:[#allocation5 + $0x1c] sm:$0x4] }
  0xb3   :  { %v2094_v30 = vadd.f32 %v884_v15, %v852_v27  ;;  %v2096_v29 = vadd.f32 %v885_v61, %v853_v7  ;;  %v2098_v25 = vadd.f32 %v886_v58, %v854_v63  ;;  %v921_v46 = vunpack.c.l.bf16 %v2079_v14  ;;  %v917_v63 = vld [vmem:[#allocation5 + $0x24] sm:$0x4]  ;;  %v920_v33 = vld [vmem:[#allocation5 + $0x3c] sm:$0x4] }
  0xb4   :  { %v2107_v2 = vadd.f32 %v888_v54, %v856_v17  ;;  %v923_v16 = vunpack.c.l.bf16 %v2090_v12  ;;  %v924_v9 = vunpack.c.l.bf16 %v2092_v55  ;;  %v925_v39 = vunpack.c.l.bf16 %v2102_v38 }
  0xb5   :  { %v961_v17 = vmul.bf16 %v913_v3, %v2079_v14  ;;  %v926_v10 = vunpack.c.l.bf16 %v2104_v52  ;;  %v963_v5 = vmul.bf16 %v915_v0, %v2090_v12  ;;  %v964_v35 = vmul.bf16 %v916_v45, %v2092_v55 }
  0xb6   :  { %v937_v59 = vrot.slane %v921_v46, 4  ;;  %v965_v61 = vmul.bf16 %v917_v63, %v2102_v38  ;;  %v939_v54 = vrot.slane %v923_v16, 4  ;;  %v940_v38 = vrot.slane %v924_v9, 4 }
  0xb7   :  { %v1246_v20 = vpop.permute.xlu0 %1245  ;;  %v1264_v28 = vpop.permute.xlu1 %1263  ;;  %v2144_v3 = vunpack.c.l.bf16 %v964_v35  ;;  %vm1331_vm10 = vcmask 1041409   ;;  %vm1334_vm11 = vcmask 1042434   ;;  %vm1337_vm12 = vcmask 1043459  }
  0xb8   :  { %v1252_v50 = vsub.f32 %v1246_v20, %v1600_v21  ;;  %v1270_v19 = vsub.f32 %v1264_v28, %v1615_v57  ;;  %v2082_v21 = vadd.f32 %v881_v44, %v849_v49  ;;  %v2084_v57 = vadd.f32 %v882_v51, %v850_v11  ;;  %v2111_v49 = vld [vmem:[#allocation2 + $0x3c] sm:$0x4]  ;;  %v919_v20 = vld [vmem:[#allocation5 + $0x34] sm:$0x4] }
  0xb9   :  { %v922_v11 = vunpack.c.l.bf16 %v2088_v48  ;;  %v962_v28 = vmul.bf16 %v914_v1, %v2088_v48  ;;  %v928_v51 = vunpack.c.l.bf16 %v2111_v49  ;;  %v953_v1 = vadd.f32 %v937_v59, %v2053_v22 }
  0xba   :  { %v1271_v62 = vmul.f32 %v1252_v50, %v1252_v50  ;;  %v1274_v23 = vmul.f32 %v1270_v19, %v1270_v19  ;;  %v968_v19 = vmul.bf16 %v920_v33, %v2111_v49  ;;  %v2149_v0 = vunpack.c.l.bf16 %v965_v61 }
  0xbb   :  { %v938_v15 = vrot.slane %v922_v11, 4  ;;  %v955_v22 = vadd.f32 %v939_v54, %v2057_v43  ;;  %v956_v33 = vadd.f32 %v940_v38, %v2068_v8  ;;  %v1014_v54 = vrot.slane %v926_v10, 5 }
  0xbc   :  { %v1255_v40 = vpop.permute.xlu0 %1254  ;;  %v1289_v47 = vpop.permute.xlu1 %1288  ;;  %v1016_v38 = vrot.slane %v928_v51, 5  ;;  %vm1340_vm13 = vcmask 1044484   ;;  %vm1343_vm14 = vcmask 1045509   ;;  %vm1346_vm15 = vcmask 1046534  }
  0xbd   :  { %v1261_v18 = vsub.f32 %v1255_v40, %v1611_v41  ;;  %v2100_v41 = vadd.f32 %v887_v56, %v855_v24  ;;  %v1295_v7 = vsub.f32 %v1289_v47, %v1649_v26  ;;  %v918_v24 = vld [vmem:[#allocation5 + $0x2c] sm:$0x4]  ;;  %v927_v26 = vunpack.c.l.bf16 %v2109_v37 }
  0xbe   :  { %v966_v58 = vmul.bf16 %v918_v24, %v2104_v52  ;;  %v967_v56 = vmul.bf16 %v919_v20, %v2109_v37  ;;  %v2136_v40 = vunpack.c.l.bf16 %v961_v17  ;;  %v2142_v47 = vunpack.c.l.bf16 %v963_v5 }
  0xbf   :  { %v1272_v4 = vmul.f32 %v1261_v18, %v1261_v18  ;;  %v1296_v50 = vand.u32 2147483647, %v1295_v7  ;;  %v2140_v18 = vunpack.c.l.bf16 %v962_v28  ;;  %v941_v52 = vrot.slane %v925_v39, 4 }
  0xc0   :  { %v2151_v45 = vunpack.c.l.bf16 %v966_v58  ;;  %v2153_v49 = vunpack.c.l.bf16 %v967_v56  ;;  %v985_v7 = vrot.slane %v2136_v40, 4  ;;  %v954_v63 = vadd.f32 %v938_v15, %v2055_v6 }
  0xc1   :  { %v1273_v27 = vadd.f32 %v1272_v4, %v1271_v62  ;;  %v942_v62 = vrot.slane %v926_v10, 4  ;;  %v943_v4 = vrot.slane %v927_v26, 4  ;;  %v1297_v37 = vadd.f32 1.0, %v1296_v50 }
  0xc2   :  { %v986_v24 = vrot.slane %v2140_v18, 4  ;;  %v987_v20 = vrot.slane %v2142_v47, 4  ;;  %v988_v17 = vrot.slane %v2144_v3, 4  ;;  %v957_v28 = vadd.f32 %v941_v52, %v2070_v36 }
  0xc3   :  { %v2123_v44 = vadd.f32 %v1274_v23, %v1273_v27  ;;  %v944_v23 = vrot.slane %v928_v51, 4  ;;  %v2155_v27 = vunpack.c.l.bf16 %v968_v19  ;;  %v958_v5 = vadd.f32 %v942_v62, %v2072_v31 }
  0xc4   :  { %v959_v35 = vadd.f32 %v943_v4, %v2074_v42  ;;  %v989_v6 = vrot.slane %v2149_v0, 4  ;;  %v990_v15 = vrot.slane %v2151_v45, 4  ;;  %v991_v61 = vrot.slane %v2153_v49, 4  ;;  %v2203_v4 = vld [vmem:[#allocation2 + $0x2c] sm:$0x8] }
  0xc5   :  { %1387 = vrsqrt.f32 %v2123_v44  ;;  %v960_v59 = vadd.f32 %v944_v23, %v2076_v32  ;;  %v992_v58 = vrot.slane %v2155_v27, 4  ;;  %v1001_v43 = vadd.f32 %v985_v7, %v2082_v21  ;;  %v2209_v7 = vld [vmem:[#allocation2 + $0x3c] sm:$0x8] }
  0xc6   :  { %1389 = vlog2.f32 %v1297_v37  ;;  %v1002_v8 = vadd.f32 %v986_v24, %v2084_v57  ;;  %v1003_v36 = vadd.f32 %v987_v20, %v2086_v34  ;;  %v1004_v31 = vadd.f32 %v988_v17, %v2094_v30  ;;  %v2207_v37 = vld [vmem:[#allocation2 + $0x34] sm:$0x8] }
  0xc7   :  { %v1009_v42 = vrot.slane %v921_v46, 5  ;;  %v1010_v56 = vrot.slane %v922_v11, 5  ;;  %v1011_v50 = vrot.slane %v923_v16, 5  ;;  %v1012_v19 = vrot.slane %v924_v9, 5  ;;  %v2192_v11 = vld [vmem:[#allocation2 + $0x4] sm:$0x8] }
  0xc8   :  { %v1013_v21 = vrot.slane %v925_v39, 5  ;;  %v1005_v57 = vadd.f32 %v989_v6, %v2096_v29  ;;  %v1015_v34 = vrot.slane %v927_v26, 5  ;;  %vm1278_vm0 = vcmp.eq.f32.partialorder %v2123_v44, inf  ;;  %v2194_v29 = vld [vmem:[#allocation2 + $0xc] sm:$0x8] }
  0xc9   :  { %vm1280_vm1 = vcmp.eq.f32.partialorder %v2123_v44, 0.0  ;;  %v1006_v14 = vadd.f32 %v990_v15, %v2098_v25  ;;  %v1007_v48 = vadd.f32 %v991_v61, %v2100_v41  ;;  %v1281_v30 = vand.u32 2147483648, %v2123_v44  ;;  %v2196_v26 = vld [vmem:[#allocation2 + $0x14] sm:$0x8]  ;;  %v2198_v25 = vld [vmem:[#allocation2 + $0x1c] sm:$0x8] }
  0xca   :  { %v1008_v55 = vadd.f32 %v992_v58, %v2107_v2  ;;  %v1025_v46 = vadd.f32 %v1009_v42, %v953_v1  ;;  %v1026_v16 = vadd.f32 %v1010_v56, %v954_v63  ;;  %v1027_v9 = vadd.f32 %v1011_v50, %v955_v22  ;;  %v2200_v41 = vld [vmem:[#allocation2 + $0x24] sm:$0x8] }
  0xcb   :  { %v1028_v39 = vadd.f32 %v1012_v19, %v956_v33  ;;  %v1029_v10 = vadd.f32 %v1013_v21, %v957_v28  ;;  %v1030_v51 = vadd.f32 %v1014_v54, %v958_v5  ;;  %v1031_v52 = vadd.f32 %v1015_v34, %v959_v35 }
  0xcc   :  { %v1032_v62 = vadd.f32 %v1016_v38, %v960_v59  ;;  %v1033_v2 = vrot.slane %v2136_v40, 5  ;;  %v1034_v23 = vrot.slane %v2140_v18, 5  ;;  %v1035_v1 = vrot.slane %v2142_v47, 5 }
  0xcd   :  { %v1073_v63 = vunpack.c.l.bf16 %v2192_v11  ;;  %v1074_v24 = vunpack.c.l.bf16 %v2194_v29  ;;  %v1075_v40 = vunpack.c.l.bf16 %v2196_v26  ;;  %v1076_v17 = vunpack.c.l.bf16 %v2198_v25 }
  0xce   :  { %v1077_v18 = vunpack.c.l.bf16 %v2200_v41  ;;  %v1036_v47 = vrot.slane %v2144_v3, 5  ;;  %v1037_v33 = vrot.slane %v2149_v0, 5  ;;  %v1038_v28 = vrot.slane %v2151_v45, 5 }
  0xcf   :  { %v1388_v32 = vpop.eup %1387  ;;  %v1078_v5 = vunpack.c.l.bf16 %v2203_v4  ;;  %v1039_v35 = vrot.slane %v2153_v49, 5  ;;  %v1040_v59 = vrot.slane %v2155_v27, 5  ;;  %v1079_v6 = vunpack.c.l.bf16 %v2207_v37 }
  0xd0   :  { %v1277_v12 = vmul.f32 %v1388_v32, %v2123_v44  ;;  %v1390_v22 = vpop.eup %1389  ;;  %v1080_v15 = vunpack.c.l.bf16 %v2209_v7  ;;  %v2229_v58 = vadd.f32 %v1033_v2, %v1001_v43  ;;  %v2231_v3 = vadd.f32 %v1034_v23, %v1002_v8  ;;  %v1067_v2 = vld [vmem:[#allocation5 + $0x14] sm:$0x8]  ;;  %v1069_v23 = vld [vmem:[#allocation5 + $0x24] sm:$0x8] }
  0xd1   :  { %v1089_v0 = vrot.slane %v1073_v63, 6  ;;  %v1090_v42 = vrot.slane %v1074_v24, 6  ;;  %v1091_v45 = vrot.slane %v1075_v40, 6  ;;  %v1092_v32 = vrot.slane %v1076_v17, 6 }
  0xd2   :  { %v1279_v20 = vsel %vm1278_vm0, %v2123_v44, %v1277_v12  ;;  %v1093_v56 = vrot.slane %v1077_v18, 6  ;;  %v2233_v50 = vadd.f32 %v1035_v1, %v1003_v36  ;;  %v2235_v49 = vadd.f32 %v1036_v47, %v1004_v31  ;;  %v1065_v12 = vld [vmem:[#allocation5 + $0x4] sm:$0x8]  ;;  %v1068_v31 = vld [vmem:[#allocation5 + $0x1c] sm:$0x8] }
  0xd3   :  { %v1282_v61 = vsel %vm1280_vm1, %v1281_v30, %v1279_v20  ;;  %v2237_v27 = vadd.f32 %v1037_v33, %v1005_v57  ;;  %v1094_v19 = vrot.slane %v1078_v5, 6  ;;  %v2239_v54 = vadd.f32 %v1038_v28, %v1006_v14  ;;  %v1066_v30 = vld [vmem:[#allocation5 + $0xc] sm:$0x8] }
  0xd4   :  { %v1283_v21 = vadd.f32 1.0, %v1282_v61  ;;  %v1095_v44 = vrot.slane %v1079_v6, 6  ;;  %v1096_v43 = vrot.slane %v1080_v15, 6  ;;  %v2241_v34 = vmul.f32 0.6931472, %v1390_v22 }
  0xd5   :  { %v2243_v8 = vadd.f32 %v1039_v35, %v1007_v48  ;;  %v2245_v38 = vadd.f32 %v1040_v59, %v1008_v55  ;;  %v1105_v36 = vadd.f32 %v1089_v0, %v1025_v46  ;;  %v1106_v57 = vadd.f32 %v1090_v42, %v1026_v16  ;;  %v1070_v14 = vld [vmem:[#allocation5 + $0x2c] sm:$0x8]  ;;  %v1071_v59 = vld [vmem:[#allocation5 + $0x34] sm:$0x8] }
  0xd6   :  { %v1107_v1 = vadd.f32 %v1091_v45, %v1027_v9  ;;  %v1108_v20 = vadd.f32 %v1092_v32, %v1028_v39  ;;  %v1109_v47 = vadd.f32 %v1093_v56, %v1029_v10  ;;  %v1110_v33 = vadd.f32 %v1094_v19, %v1030_v51 }
  0xd7   :  { %v1161_v28 = vrot.slane %v1073_v63, 7  ;;  %v1162_v61 = vrot.slane %v1074_v24, 7  ;;  %v1163_v22 = vrot.slane %v1075_v40, 7  ;;  %1391 = vlog2.f32 %v1283_v21 }
  0xd8   :  { %v1111_v48 = vadd.f32 %v1095_v44, %v1031_v52  ;;  %v1112_v35 = vadd.f32 %v1096_v43, %v1032_v62  ;;  %v1164_v55 = vrot.slane %v1076_v17, 7  ;;  %v1113_v46 = vmul.bf16 %v1065_v12, %v2192_v11 }
  0xd9   :  { %v1114_v0 = vmul.bf16 %v1066_v30, %v2194_v29  ;;  %v1115_v16 = vmul.bf16 %v1067_v2, %v2196_v26  ;;  %v1165_v9 = vrot.slane %v1077_v18, 7  ;;  %v1116_v39 = vmul.bf16 %v1068_v31, %v2198_v25 }
  0xda   :  { %v1117_v10 = vmul.bf16 %v1069_v23, %v2200_v41  ;;  %v1118_v51 = vmul.bf16 %v1070_v14, %v2203_v4  ;;  %v1166_v63 = vrot.slane %v1078_v5, 7  ;;  %v1167_v24 = vrot.slane %v1079_v6, 7 }
  0xdb   :  { %v1177_v52 = vadd.f32 %v1161_v28, %v1105_v36  ;;  %v1178_v62 = vadd.f32 %v1162_v61, %v1106_v57  ;;  %v1179_v40 = vadd.f32 %v1163_v22, %v1107_v1  ;;  %v1119_v17 = vmul.bf16 %v1071_v59, %v2207_v37 }
  0xdc   :  { %v1120_v11 = vmul.bf16 %v1072_v13, %v2209_v7  ;;  %v1168_v42 = vrot.slane %v1080_v15, 7  ;;  %v1180_v29 = vadd.f32 %v1164_v55, %v1108_v20  ;;  %v1121_v45 = vunpack.c.l.bf16 %v1113_v46 }
  0xdd   :  { %v1122_v26 = vunpack.c.l.bf16 %v1114_v0  ;;  %v2255_v18 = vunpack.c.l.bf16 %v1115_v16  ;;  %v1181_v25 = vadd.f32 %v1165_v9, %v1109_v47  ;;  %v2257_v32 = vunpack.c.l.bf16 %v1116_v39  ;;  %v1303_v16 = vpop.permute.xlu1 %1302 }
  0xde   :  { %v2259_v41 = vunpack.c.l.bf16 %v1117_v10  ;;  %v2261_v4 = vunpack.c.l.bf16 %v1118_v51  ;;  %v1182_v5 = vadd.f32 %v1166_v63, %v1110_v33  ;;  %v1183_v6 = vadd.f32 %v1167_v24, %v1111_v48 }
  0xdf   :  { %vm1209_vm2 = vcmp.eq.f32.partialorder %v1177_v52, 0.0  ;;  %vm1210_vm3 = vcmp.eq.f32.partialorder %v1178_v62, 0.0  ;;  %vm1211_vm4 = vcmp.eq.f32.partialorder %v1179_v40, 0.0  ;;  %v2263_v37 = vunpack.c.l.bf16 %v1119_v17 }
  0xe0   :  { %v2265_v13 = vunpack.c.l.bf16 %v1120_v11  ;;  %v1184_v7 = vadd.f32 %v1168_v42, %v1112_v35  ;;  %vm1212_vm5 = vcmp.eq.f32.partialorder %v1180_v29, 0.0  ;;  %v1137_v15 = vrot.slane %v1121_v45, 6 }
  0xe1   :  { %vm1213_vm6 = vcmp.eq.f32.partialorder %v1181_v25, 0.0  ;;  %v1217_v56 = vsel %vm1209_vm2, 1.0, %v1177_v52  ;;  %v1218_v19 = vsel %vm1210_vm3, 1.0, %v1178_v62  ;;  %v1392_v21 = vpop.eup %1391  ;;  %v1138_v44 = vrot.slane %v1122_v26, 6 }
  0xe2   :  { %v1139_v43 = vrot.slane %v2255_v18, 6  ;;  %vm1214_vm7 = vcmp.eq.f32.partialorder %v1182_v5, 0.0  ;;  %v1219_v12 = vsel %vm1211_vm4, 1.0, %v1179_v40  ;;  %v1140_v30 = vrot.slane %v2257_v32, 6 }
  0xe3   :  { %vm1215_vm8 = vcmp.eq.f32.partialorder %v1183_v6, 0.0  ;;  %v1220_v36 = vsel %vm1212_vm5, 1.0, %v1180_v29  ;;  %1393 = vrcp.f32 %v1217_v56  ;;  %v1141_v2 = vrot.slane %v2259_v41, 6 }
  0xe4   :  { %vm1216_vm9 = vcmp.eq.f32.partialorder %v1184_v7, 0.0  ;;  %v1221_v31 = vsel %vm1213_vm6, 1.0, %v1181_v25  ;;  %1395 = vrcp.f32 %v1218_v19  ;;  %v1142_v23 = vrot.slane %v2261_v4, 6 }
  0xe5   :  { %v1153_v57 = vadd.f32 %v1137_v15, %v2229_v58  ;;  %v1222_v1 = vsel %vm1214_vm7, 1.0, %v1182_v5  ;;  %1397 = vrcp.f32 %v1219_v12  ;;  %v1285_v20 = vmul.f32 0.6931472, %v1392_v21 }
  0xe6   :  { %v1154_v47 = vadd.f32 %v1138_v44, %v2231_v3  ;;  %v1223_v14 = vsel %vm1215_vm8, 1.0, %v1183_v6  ;;  %1399 = vrcp.f32 %v1220_v36  ;;  %v1185_v33 = vrot.slane %v1121_v45, 7 }
  0xe7   :  { %v1186_v28 = vrot.slane %v1122_v26, 7  ;;  %v1224_v61 = vsel %vm1216_vm9, 1.0, %v1184_v7  ;;  %1401 = vrcp.f32 %v1221_v31  ;;  %v1143_v22 = vrot.slane %v2263_v37, 6 }
  0xe8   :  { %v1155_v48 = vadd.f32 %v1139_v43, %v2233_v50  ;;  %v1187_v35 = vrot.slane %v2255_v18, 7  ;;  %1403 = vrcp.f32 %v1222_v1  ;;  %v1144_v58 = vrot.slane %v2265_v13, 6  ;;  %v2309_v18 = vld [vmem:[#allocation12_spill] sm:$0xff] }
  0xe9   :  { %v1156_v55 = vadd.f32 %v1140_v30, %v2235_v49  ;;  %v1188_v59 = vrot.slane %v2257_v32, 7  ;;  %1405 = vrcp.f32 %v1223_v14  ;;  %v1286_v3 = vmul.f32 0.4342945, %v1285_v20 }
  0xea   :  { %v1157_v46 = vadd.f32 %v1141_v2, %v2237_v27  ;;  %v1189_v0 = vrot.slane %v2259_v41, 7  ;;  %1407 = vrcp.f32 %v1224_v61  ;;  %v1158_v9 = vadd.f32 %v1142_v23, %v2239_v54 }
  0xeb   :  { %v1190_v50 = vrot.slane %v2261_v4, 7  ;;  %v1201_v39 = vadd.f32 %v1185_v33, %v1153_v57  ;;  %v1202_v10 = vadd.f32 %v1186_v28, %v1154_v47  ;;  %v1300_v51 = vmul.f32 0.4342945, %v2241_v34 }
  0xec   :  { %v1159_v49 = vadd.f32 %v1143_v22, %v2243_v8  ;;  %v1191_v63 = vrot.slane %v2263_v37, 7  ;;  %v1203_v24 = vadd.f32 %v1187_v35, %v1155_v48  ;;  %v1160_v27 = vadd.f32 %v1144_v58, %v2245_v38 }
  0xed   :  { %v1394_v52 = vpop.eup %1393  ;;  %v1192_v62 = vrot.slane %v2265_v13, 7  ;;  %v1204_v40 = vadd.f32 %v1188_v59, %v1156_v55  ;;  %v1309_v54 = vmul.f32 %v1718_v53, %v1303_v16  ;;  %v1314_v11 = vmul.f32 %v1724_v60, %v1286_v3 }
  0xee   :  { %v1396_v17 = vpop.eup %1395  ;;  %v1205_v42 = vadd.f32 %v1189_v0, %v1157_v46  ;;  %v1206_v45 = vadd.f32 %v1190_v50, %v1158_v9  ;;  %v1233_v34 = vmul.f32 %v1394_v52, %v1201_v39  ;;  %v1320_v25 = vmul.f32 %v2309_v18, %v1300_v51 }
  0xef   :  { %v1398_v29 = vpop.eup %1397  ;;  %v1234_v26 = vmul.f32 %v1396_v17, %v1202_v10  ;;  %v1207_v32 = vadd.f32 %v1191_v63, %v1159_v49  ;;  %v1208_v4 = vadd.f32 %v1192_v62, %v1160_v27  ;;  %v1315_v53 = vsub.f32 %v1309_v54, %v1314_v11 }
  0xf0   :  { %v1400_v8 = vpop.eup %1399  ;;  %v1235_v41 = vmul.f32 %v1398_v29, %v1203_v24  ;;  %vm1349_vm0 = vcmask 1047559  }
  0xf1   :  { %v1402_v38 = vpop.eup %1401  ;;  %v1236_v5 = vmul.f32 %v1400_v8, %v1204_v40  ;;  %v1330_v6 = vrot.slane %v1234_v26, 7  ;;  %v1321_v31 = vadd.f32 %v1320_v25, %v1315_v53 }
  0xf2   :  { %v1404_v37 = vpop.eup %1403  ;;  %v1237_v13 = vmul.f32 %v1402_v38, %v1205_v42  ;;  %v1333_v60 = vrot.slane %v1235_v41, 6 }
  0xf3   :  { %v1406_v7 = vpop.eup %1405  ;;  %v1238_v15 = vmul.f32 %v1404_v37, %v1206_v45  ;;  %v1332_v56 = vsel %vm1331_vm10, %v1330_v6, %v1233_v34  ;;  %v1336_v19 = vrot.slane %v1236_v5, 5 }
  0xf4   :  { %v1408_v21 = vpop.eup %1407  ;;  %v1239_v44 = vmul.f32 %v1406_v7, %v1207_v32  ;;  %v1335_v43 = vsel %vm1334_vm11, %v1333_v60, %v1332_v56  ;;  %v1339_v12 = vrot.slane %v1237_v13, 4 }
  0xf5   :  { %v1240_v30 = vmul.f32 %v1408_v21, %v1208_v4  ;;  %v1338_v36 = vsel %vm1337_vm12, %v1336_v19, %v1335_v43  ;;  %v1342_v2 = vrot.slane %v1238_v15, 3 }
  0xf6   :  { %v1341_v23 = vsel %vm1340_vm13, %v1339_v12, %v1338_v36  ;;  %v1345_v57 = vrot.slane %v1239_v44, 2 }
  0xf7   :  { %v1344_v1 = vsel %vm1343_vm14, %v1342_v2, %v1341_v23  ;;  %v1348_v20 = vrot.slane %v1240_v30, 1 }
  0xf8   :  { %v1347_v47 = vsel %vm1346_vm15, %v1345_v57, %v1344_v1 }
  0xf9   :  { %v1350_v14 = vsel %vm1349_vm0, %v1348_v20, %v1347_v47 }
  0xfa   :  { %v1352_v33 = vadd.f32 %v1350_v14, %v1321_v31 }
  0xfc   :  { %1353 = vst [vmem:[#allocation8] sm:$0xff] %v1352_v33 }
  0xfd   :  { %1486 = shalt.err (!%p1483_p0)
}
  0xfe   :  { %s1487_s30 = scalar_lea.hbm %s2307_s4, 128 }
  0xff   :  { %p1488_p1 = scmp.ne.s32.totalorder %s2307_s4, %s1487_s30  ;;  %p1491_p2 = scmp.lt.u32.totalorder %s1487_s30, %s2307_s4 }
 0x101   :  { %p1493_p3 = pnand %p1491_p2, %p1488_p1 }
 0x103   :  { %1496 = shalt.err (!%p1493_p3)
}
 0x104   :  { %1363 = dma.vmem_to_hbm [thread:$0]  %s1361_s26, 128, %s2307_s4, [#allocation4]  }
 0x105   :  { %1501 = dma.done.wait [#allocation4], 128  }
 0x106   :  { %1502 = vsyncadd [#allocation4], 4294967168 }
 0x107   :  { %1367 = vsyncpa [#allocation3], 1 }
 0x108   :  { %1368 = vsyncpa [#allocation6], 1 }
 0x109   :  { %1369 = vsyncpa [#allocation4], 1 }

</bundles_post_ra>
